<compile_context>
chip_gen: v7x
topology: tpu7x:2x2x1
jax: 0.10.0
libtpu: 0.0.40
codegen_flags: <defaults>
</compile_context>

<pallas_src>
import functools
import math

import jax
import jax.numpy as jnp
from jax import lax
from jax.experimental import pallas as pl
from jax.experimental.pallas import tpu as pltpu

# ---- model config (Unmasker defaults, with small vocab/seq for the demo) ----
VOCAB = 32                  # vocab_size
N_DIM = 16                  # sequence length == frequency_embedding_size
EMBED = 128                 # embed_dim
HEADS = 4                   # num_heads
HEAD_DIM = EMBED // HEADS
LAYERS = 4                  # num_layers
HIDDEN = 256                # dim_feedforward
MASK_ID = VOCAB - 1
NEG_INF = -1.0e9
EPS = 1e-5                  # LayerNorm eps (PyTorch default)
B = 2                       # batch
ROWS = B * N_DIM            # rows of the (rows, EMBED) activation slab


def _layernorm(x, g, b):
    mu = jnp.mean(x, axis=-1, keepdims=True)
    var = jnp.mean((x - mu) ** 2, axis=-1, keepdims=True)
    return (x - mu) * lax.rsqrt(var + EPS) * g + b


def unmasker_kernel(
    # static inputs (constant block index across the layer grid axis)
    x_in_ref, t_freq_ref, xt_ref,
    tw1_ref, tb1_ref, tw2_ref, tb2_ref,
    wout_ref, bout_ref,
    # per-layer inputs (leading LAYERS axis blocked by the grid)
    wqkv_ref, bqkv_ref, wo_ref, bo_ref,
    ln1g_ref, ln1b_ref, ln2g_ref, ln2b_ref,
    wff1_ref, bff1_ref, wff2_ref, bff2_ref,
    # output
    out_ref,
    # scratch: residual stream, persistent across the layer grid axis
    x2_scr,
):
    f32 = jnp.float32
    bf16 = jnp.bfloat16
    li = pl.program_id(0)

    # ---- step 0 prologue: TimestepEmbedder MLP + add to token+pos embeds ----
    @pl.when(li == 0)
    def _init():
        h = jnp.dot(t_freq_ref[...].astype(bf16), tw1_ref[...],
                    preferred_element_type=f32) + tb1_ref[...]
        h = h * jax.nn.sigmoid(h)                                    # SiLU
        t_emb = jnp.dot(h.astype(bf16), tw2_ref[...],
                        preferred_element_type=f32) + tb2_ref[...]   # (B, D)
        x3 = x_in_ref[...] + jnp.reshape(t_emb, (B, 1, EMBED))       # (B, S, D)
        x2_scr[...] = jnp.reshape(x3, (ROWS, EMBED))

    x2 = x2_scr[...]                                                 # (ROWS, D) f32

    # ---- multi-head self-attention (post-LN encoder layer) ----
    qkv = jnp.dot(x2.astype(bf16), wqkv_ref[...],
                  preferred_element_type=f32) + bqkv_ref[...]        # (ROWS, 3D)
    q3 = jnp.reshape(qkv[:, 0:EMBED], (B, N_DIM, EMBED)).astype(bf16)
    k3 = jnp.reshape(qkv[:, EMBED:2 * EMBED], (B, N_DIM, EMBED)).astype(bf16)
    v3 = jnp.reshape(qkv[:, 2 * EMBED:3 * EMBED], (B, N_DIM, EMBED)).astype(bf16)

    ctx_heads = []
    for h_idx in range(HEADS):
        sl = slice(h_idx * HEAD_DIM, (h_idx + 1) * HEAD_DIM)
        # 1/sqrt(head_dim) is pre-folded into the Q projection (see wrapper).
        s = jnp.einsum('bqd,bkd->bqk', q3[:, :, sl], k3[:, :, sl],
                       preferred_element_type=f32)                   # (B, S, S)
        m = jnp.max(s, axis=-1, keepdims=True)
        p = jnp.exp(s - m)
        p = p * pl.reciprocal(jnp.sum(p, axis=-1, keepdims=True), approx=True)
        ctx = jnp.einsum('bqk,bkd->bqd', p.astype(bf16), v3[:, :, sl],
                         preferred_element_type=f32)                 # (B, S, HD)
        ctx_heads.append(jnp.reshape(ctx, (ROWS, HEAD_DIM)))
    # single full-width (K=128) output projection instead of 4 partial dots
    ctx_all = jnp.concatenate(ctx_heads, axis=-1).astype(bf16)       # (ROWS, D)
    attn = jnp.dot(ctx_all, wo_ref[...],
                   preferred_element_type=f32) + bo_ref[...]

    x2 = _layernorm(x2 + attn, ln1g_ref[...], ln1b_ref[...])

    # ---- feed-forward (relu activation, PyTorch default) ----
    ff = jnp.dot(x2.astype(bf16), wff1_ref[...],
                 preferred_element_type=f32) + bff1_ref[...]
    ff = jnp.maximum(ff, 0.0)
    ff = jnp.dot(ff.astype(bf16), wff2_ref[...],
                 preferred_element_type=f32) + bff2_ref[...]
    x2 = _layernorm(x2 + ff, ln2g_ref[...], ln2b_ref[...])

    x2_scr[...] = x2

    # ---- last layer: output projection + SUBS parameterization ----
    @pl.when(li == LAYERS - 1)
    def _finalize():
        logits = jnp.dot(x2.astype(bf16), wout_ref[...],
                         preferred_element_type=f32) + bout_ref[...]  # (ROWS, V)
        vocab_iota = lax.broadcasted_iota(jnp.int32, (ROWS, VOCAB), 1)
        xt_col = xt_ref[...]                                          # (ROWS, 1)
        # logits[:, mask_id] += -1e9
        logits = logits + jnp.where(vocab_iota == MASK_ID, NEG_INF, 0.0)
        # log-softmax
        m = jnp.max(logits, axis=-1, keepdims=True)
        lse = m + jnp.log(jnp.sum(jnp.exp(logits - m), axis=-1, keepdims=True))
        logits = logits - lse
        # unmasked positions -> -1e9 everywhere, 0 at the observed token
        unmasked = xt_col != MASK_ID
        onehot = vocab_iota == xt_col
        out_ref[...] = jnp.where(unmasked,
                                 jnp.where(onehot, 0.0, NEG_INF),
                                 logits)


def build_params(key):
    ks = jax.random.split(key, 10)

    def init(k, shape, scale=0.05):
        return (scale * jax.random.normal(k, shape)).astype(jnp.float32)

    z = lambda *s: jnp.zeros(s, jnp.float32)
    o = lambda *s: jnp.ones(s, jnp.float32)
    return dict(
        tok_embed=init(ks[0], (VOCAB, EMBED)),
        # TimestepEmbedder MLP
        tw1=init(ks[1], (N_DIM, EMBED)), tb1=z(1, EMBED),
        tw2=init(ks[2], (EMBED, EMBED)), tb2=z(1, EMBED),
        # per-layer transformer weights (stacked along leading layer axis)
        wqkv=init(ks[3], (LAYERS, EMBED, 3 * EMBED)), bqkv=z(LAYERS, 1, 3 * EMBED),
        wo=init(ks[4], (LAYERS, EMBED, EMBED)), bo=z(LAYERS, 1, EMBED),
        ln1g=o(LAYERS, 1, EMBED), ln1b=z(LAYERS, 1, EMBED),
        ln2g=o(LAYERS, 1, EMBED), ln2b=z(LAYERS, 1, EMBED),
        wff1=init(ks[5], (LAYERS, EMBED, HIDDEN)), bff1=z(LAYERS, 1, HIDDEN),
        wff2=init(ks[6], (LAYERS, HIDDEN, EMBED)), bff2=z(LAYERS, 1, EMBED),
        # output head
        wout=init(ks[7], (EMBED, VOCAB)), bout=z(1, VOCAB),
    )


def unmasker_forward(params, xt, t):
    f32 = jnp.float32
    bf16 = jnp.bfloat16

    # --- glue: embedding gather + sinusoidal tables (irregular / table setup) ---
    tok = params['tok_embed'][xt]                                     # (B, S, D)

    pos = jnp.arange(N_DIM, dtype=f32)[:, None]
    div = jnp.exp(jnp.arange(0, EMBED, 2, dtype=f32) * (-math.log(10000.0) / EMBED))
    pe = jnp.zeros((N_DIM, EMBED), f32)
    pe = pe.at[:, 0::2].set(jnp.sin(pos * div))
    pe = pe.at[:, 1::2].set(jnp.cos(pos * div))
    x_in = tok + pe[None]            # PositionalEncoding; dropout = identity (eval)

    half = N_DIM // 2
    freqs = jnp.exp(-math.log(10000.0) * jnp.arange(half, dtype=f32) / half)
    args = t[:, None].astype(f32) * freqs[None]
    t_freq = jnp.concatenate([jnp.cos(args), jnp.sin(args)], axis=-1)  # (B, N_DIM)

    xt_col = xt.astype(jnp.int32).reshape(ROWS, 1)                     # (B*S, 1)

    # fold 1/sqrt(head_dim) into the Q projection (weights + bias)
    scale = 1.0 / math.sqrt(HEAD_DIM)
    wqkv = params['wqkv'].at[:, :, :EMBED].multiply(scale)
    bqkv = params['bqkv'].at[:, :, :EMBED].multiply(scale)

    inputs = (
        # static
        x_in, t_freq, xt_col,
        params['tw1'].astype(bf16), params['tb1'],
        params['tw2'].astype(bf16), params['tb2'],
        params['wout'].astype(bf16), params['bout'],
        # per-layer
        wqkv.astype(bf16), bqkv,
        params['wo'].astype(bf16), params['bo'],
        params['ln1g'], params['ln1b'], params['ln2g'], params['ln2b'],
        params['wff1'].astype(bf16), params['bff1'],
        params['wff2'].astype(bf16), params['bff2'],
    )

    def static_spec(shape):
        nd = len(shape)
        return pl.BlockSpec(shape, lambda l, nd=nd: (0,) * nd)

    def layered_spec(shape):          # shape excludes the leading LAYERS axis
        nd = len(shape)
        return pl.BlockSpec((None,) + shape, lambda l, nd=nd: (l,) + (0,) * nd)

    in_specs = [
        static_spec((B, N_DIM, EMBED)),       # x_in
        static_spec((B, N_DIM)),              # t_freq
        static_spec((ROWS, 1)),               # xt
        static_spec((N_DIM, EMBED)),          # tw1
        static_spec((1, EMBED)),              # tb1
        static_spec((EMBED, EMBED)),          # tw2
        static_spec((1, EMBED)),              # tb2
        static_spec((EMBED, VOCAB)),          # wout
        static_spec((1, VOCAB)),              # bout
        layered_spec((EMBED, 3 * EMBED)),     # wqkv
        layered_spec((1, 3 * EMBED)),         # bqkv
        layered_spec((EMBED, EMBED)),         # wo
        layered_spec((1, EMBED)),             # bo
        layered_spec((1, EMBED)),             # ln1g
        layered_spec((1, EMBED)),             # ln1b
        layered_spec((1, EMBED)),             # ln2g
        layered_spec((1, EMBED)),             # ln2b
        layered_spec((EMBED, HIDDEN)),        # wff1
        layered_spec((1, HIDDEN)),            # bff1
        layered_spec((HIDDEN, EMBED)),        # wff2
        layered_spec((1, EMBED)),             # bff2
    ]

    out2 = pl.pallas_call(
        unmasker_kernel,
        out_shape=jax.ShapeDtypeStruct((ROWS, VOCAB), jnp.float32),
        grid=(LAYERS,),
        in_specs=in_specs,
        out_specs=pl.BlockSpec((ROWS, VOCAB), lambda l: (0, 0)),
        scratch_shapes=[pltpu.VMEM((ROWS, EMBED), jnp.float32)],
        compiler_params=pltpu.CompilerParams(
            dimension_semantics=("arbitrary",),
            vmem_limit_bytes=8 << 20,
        ),
    )(*inputs)
    return out2.reshape(B, N_DIM, VOCAB)


if __name__ == "__main__":
    key = jax.random.PRNGKey(0)
    pkey, xkey, tkey = jax.random.split(key, 3)
    params = build_params(pkey)

    xt = jax.random.randint(xkey, (B, N_DIM), 0, VOCAB, dtype=jnp.int32)
    xt = xt.at[:, ::2].set(MASK_ID)          # mix of masked and unmasked tokens
    t = jax.random.uniform(tkey, (B,), dtype=jnp.float32)

    fwd = jax.jit(functools.partial(unmasker_forward, params))
    out = fwd(xt, t)
    jax.block_until_ready(out)

    assert out.shape == (B, N_DIM, VOCAB) and out.dtype == jnp.float32
    print("KERNEL_OK")
</pallas_src>

<mosaic_0001>
module attributes {stable_mosaic.version = 11 : i64} {
  func.func @unmasker_kernel(%arg0: i32, %arg1: memref<2x16x128xf32, #tpu.memory_space<vmem>>, %arg2: memref<2x16xf32, #tpu.memory_space<vmem>>, %arg3: memref<32x1xi32, #tpu.memory_space<vmem>>, %arg4: memref<16x128xbf16, #tpu.memory_space<vmem>>, %arg5: memref<1x128xf32, #tpu.memory_space<vmem>>, %arg6: memref<128x128xbf16, #tpu.memory_space<vmem>>, %arg7: memref<1x128xf32, #tpu.memory_space<vmem>>, %arg8: memref<128x32xbf16, #tpu.memory_space<vmem>>, %arg9: memref<1x32xf32, #tpu.memory_space<vmem>>, %arg10: memref<1x128x384xbf16, #tpu.memory_space<vmem>>, %arg11: memref<1x1x384xf32, #tpu.memory_space<vmem>>, %arg12: memref<1x128x128xbf16, #tpu.memory_space<vmem>>, %arg13: memref<1x1x128xf32, #tpu.memory_space<vmem>>, %arg14: memref<1x1x128xf32, #tpu.memory_space<vmem>>, %arg15: memref<1x1x128xf32, #tpu.memory_space<vmem>>, %arg16: memref<1x1x128xf32, #tpu.memory_space<vmem>>, %arg17: memref<1x1x128xf32, #tpu.memory_space<vmem>>, %arg18: memref<1x128x256xbf16, #tpu.memory_space<vmem>>, %arg19: memref<1x1x256xf32, #tpu.memory_space<vmem>>, %arg20: memref<1x256x128xbf16, #tpu.memory_space<vmem>>, %arg21: memref<1x1x128xf32, #tpu.memory_space<vmem>>, %arg22: memref<32x32xf32, #tpu.memory_space<vmem>>, %arg23: memref<32x128xf32, #tpu.memory_space<vmem>>) attributes {dimension_semantics = [#tpu.dimension_semantics<arbitrary>], iteration_bounds = array<i64: 4>, scalar_prefetch = 0 : i64, scratch_operands = 1 : i64, tpu.core_type = #tpu.core_type<tc>, window_params = [{pipeline_mode = #tpu.pipeline_mode<synchronous>, transform_indices = @transform_0, window_bounds = array<i64: 2, 16, 128>}, {pipeline_mode = #tpu.pipeline_mode<synchronous>, transform_indices = @transform_1, window_bounds = array<i64: 2, 16>}, {pipeline_mode = #tpu.pipeline_mode<synchronous>, transform_indices = @transform_2, window_bounds = array<i64: 32, 1>}, {pipeline_mode = #tpu.pipeline_mode<synchronous>, transform_indices = @transform_3, window_bounds = array<i64: 16, 128>}, {pipeline_mode = #tpu.pipeline_mode<synchronous>, transform_indices = @transform_4, window_bounds = array<i64: 1, 128>}, {pipeline_mode = #tpu.pipeline_mode<synchronous>, transform_indices = @transform_5, window_bounds = array<i64: 128, 128>}, {pipeline_mode = #tpu.pipeline_mode<synchronous>, transform_indices = @transform_6, window_bounds = array<i64: 1, 128>}, {pipeline_mode = #tpu.pipeline_mode<synchronous>, transform_indices = @transform_7, window_bounds = array<i64: 128, 32>}, {pipeline_mode = #tpu.pipeline_mode<synchronous>, transform_indices = @transform_8, window_bounds = array<i64: 1, 32>}, {transform_indices = @transform_9, window_bounds = array<i64: 1, 128, 384>}, {transform_indices = @transform_10, window_bounds = array<i64: 1, 1, 384>}, {transform_indices = @transform_11, window_bounds = array<i64: 1, 128, 128>}, {transform_indices = @transform_12, window_bounds = array<i64: 1, 1, 128>}, {transform_indices = @transform_13, window_bounds = array<i64: 1, 1, 128>}, {transform_indices = @transform_14, window_bounds = array<i64: 1, 1, 128>}, {transform_indices = @transform_15, window_bounds = array<i64: 1, 1, 128>}, {transform_indices = @transform_16, window_bounds = array<i64: 1, 1, 128>}, {transform_indices = @transform_17, window_bounds = array<i64: 1, 128, 256>}, {transform_indices = @transform_18, window_bounds = array<i64: 1, 1, 256>}, {transform_indices = @transform_19, window_bounds = array<i64: 1, 256, 128>}, {transform_indices = @transform_20, window_bounds = array<i64: 1, 1, 128>}, {pipeline_mode = #tpu.pipeline_mode<synchronous>, transform_indices = @transform_21, window_bounds = array<i64: 32, 32>}]} {
    %c0_i32 = arith.constant 0 : i32
    %0 = arith.cmpi eq, %arg0, %c0_i32 : i32
    %1 = arith.extui %0 : i1 to i32
    %c0_i32_0 = arith.constant 0 : i32
    %2 = arith.cmpi ne, %1, %c0_i32_0 : i32
    scf.if %2 {
      %c0_71 = arith.constant 0 : index
      %c0_72 = arith.constant 0 : index
      %174 = vector.load %arg2[%c0_71, %c0_72] : memref<2x16xf32, #tpu.memory_space<vmem>>, vector<2x16xf32>
      %175 = arith.truncf %174 : vector<2x16xf32> to vector<2x16xbf16>
      %c0_73 = arith.constant 0 : index
      %c0_74 = arith.constant 0 : index
      %176 = vector.load %arg4[%c0_73, %c0_74] : memref<16x128xbf16, #tpu.memory_space<vmem>>, vector<16x128xbf16>
      %cst_75 = arith.constant dense<0.000000e+00> : vector<2x128xf32>
      %177 = tpu.matmul %175, %176, %cst_75 {dimension_numbers = #tpu.dot_dimension_numbers<[1], [0], [0], [1], [0, 0, 1, 1], [], []>} : vector<2x16xbf16>, vector<16x128xbf16>, vector<2x128xf32> -> vector<2x128xf32>
      %c0_76 = arith.constant 0 : index
      %c0_77 = arith.constant 0 : index
      %178 = vector.load %arg5[%c0_76, %c0_77] : memref<1x128xf32, #tpu.memory_space<vmem>>, vector<1x128xf32>
      %179 = vector.broadcast %178 : vector<1x128xf32> to vector<2x128xf32>
      %180 = arith.addf %177, %179 : vector<2x128xf32>
      %181 = arith.negf %180 : vector<2x128xf32>
      %182 = math.exp %181 : vector<2x128xf32>
      %cst_78 = arith.constant 1.000000e+00 : f32
      %183 = vector.broadcast %cst_78 : f32 to vector<2x128xf32>
      %184 = arith.addf %183, %182 : vector<2x128xf32>
      %185 = arith.divf %183, %184 : vector<2x128xf32>
      %186 = arith.mulf %180, %185 : vector<2x128xf32>
      %187 = arith.truncf %186 : vector<2x128xf32> to vector<2x128xbf16>
      %c0_79 = arith.constant 0 : index
      %c0_80 = arith.constant 0 : index
      %188 = vector.load %arg6[%c0_79, %c0_80] : memref<128x128xbf16, #tpu.memory_space<vmem>>, vector<128x128xbf16>
      %cst_81 = arith.constant dense<0.000000e+00> : vector<2x128xf32>
      %189 = tpu.matmul %187, %188, %cst_81 {dimension_numbers = #tpu.dot_dimension_numbers<[1], [0], [0], [1], [0, 0, 1, 1], [], []>} : vector<2x128xbf16>, vector<128x128xbf16>, vector<2x128xf32> -> vector<2x128xf32>
      %c0_82 = arith.constant 0 : index
      %c0_83 = arith.constant 0 : index
      %190 = vector.load %arg7[%c0_82, %c0_83] : memref<1x128xf32, #tpu.memory_space<vmem>>, vector<1x128xf32>
      %191 = vector.broadcast %190 : vector<1x128xf32> to vector<2x128xf32>
      %192 = arith.addf %189, %191 : vector<2x128xf32>
      %c0_84 = arith.constant 0 : index
      %c0_85 = arith.constant 0 : index
      %c0_86 = arith.constant 0 : index
      %193 = vector.load %arg1[%c0_84, %c0_85, %c0_86] : memref<2x16x128xf32, #tpu.memory_space<vmem>>, vector<2x16x128xf32>
      %194 = vector.shape_cast %192 : vector<2x128xf32> to vector<2x1x128xf32>
      %195 = vector.broadcast %194 : vector<2x1x128xf32> to vector<2x16x128xf32>
      %196 = arith.addf %193, %195 : vector<2x16x128xf32>
      %197 = vector.shape_cast %196 : vector<2x16x128xf32> to vector<32x128xf32>
      %c0_87 = arith.constant 0 : index
      %c0_88 = arith.constant 0 : index
      %198 = vector.load %arg23[%c0_87, %c0_88] : memref<32x128xf32, #tpu.memory_space<vmem>>, vector<32x128xf32>
      tpu.vector_store %arg23[%c0_87, %c0_88], %197 {strides = array<i32>} : memref<32x128xf32, #tpu.memory_space<vmem>>, vector<32x128xf32>,
    } else {
    }
    %c0 = arith.constant 0 : index
    %c0_1 = arith.constant 0 : index
    %3 = vector.load %arg23[%c0, %c0_1] : memref<32x128xf32, #tpu.memory_space<vmem>>, vector<32x128xf32>
    %4 = arith.truncf %3 : vector<32x128xf32> to vector<32x128xbf16>
    %c0_2 = arith.constant 0 : index
    %c0_3 = arith.constant 0 : index
    %c0_4 = arith.constant 0 : index
    %5 = vector.load %arg10[%c0_2, %c0_3, %c0_4] : memref<1x128x384xbf16, #tpu.memory_space<vmem>>, vector<1x128x384xbf16>
    %6 = vector.shape_cast %5 : vector<1x128x384xbf16> to vector<128x384xbf16>
    %cst = arith.constant dense<0.000000e+00> : vector<32x384xf32>
    %7 = tpu.matmul %4, %6, %cst {dimension_numbers = #tpu.dot_dimension_numbers<[1], [0], [0], [1], [0, 0, 1, 1], [], []>} : vector<32x128xbf16>, vector<128x384xbf16>, vector<32x384xf32> -> vector<32x384xf32>
    %c0_5 = arith.constant 0 : index
    %c0_6 = arith.constant 0 : index
    %c0_7 = arith.constant 0 : index
    %8 = vector.load %arg11[%c0_5, %c0_6, %c0_7] : memref<1x1x384xf32, #tpu.memory_space<vmem>>, vector<1x1x384xf32>
    %9 = vector.shape_cast %8 : vector<1x1x384xf32> to vector<1x384xf32>
    %10 = vector.broadcast %9 : vector<1x384xf32> to vector<32x384xf32>
    %11 = arith.addf %7, %10 : vector<32x384xf32>
    %12 = vector.extract_strided_slice %11 {offsets = [0, 0], sizes = [32, 128], strides = [1, 1]} : vector<32x384xf32> to vector<32x128xf32>
    %13 = vector.shape_cast %12 : vector<32x128xf32> to vector<2x16x128xf32>
    %14 = arith.truncf %13 : vector<2x16x128xf32> to vector<2x16x128xbf16>
    %15 = vector.extract_strided_slice %11 {offsets = [0, 128], sizes = [32, 128], strides = [1, 1]} : vector<32x384xf32> to vector<32x128xf32>
    %16 = vector.shape_cast %15 : vector<32x128xf32> to vector<2x16x128xf32>
    %17 = arith.truncf %16 : vector<2x16x128xf32> to vector<2x16x128xbf16>
    %18 = vector.extract_strided_slice %11 {offsets = [0, 256], sizes = [32, 128], strides = [1, 1]} : vector<32x384xf32> to vector<32x128xf32>
    %19 = vector.shape_cast %18 : vector<32x128xf32> to vector<2x16x128xf32>
    %20 = arith.truncf %19 : vector<2x16x128xf32> to vector<2x16x128xbf16>
    %21 = vector.extract_strided_slice %14 {offsets = [0, 0, 0], sizes = [2, 16, 32], strides = [1, 1, 1]} : vector<2x16x128xbf16> to vector<2x16x32xbf16>
    %22 = vector.extract_strided_slice %17 {offsets = [0, 0, 0], sizes = [2, 16, 32], strides = [1, 1, 1]} : vector<2x16x128xbf16> to vector<2x16x32xbf16>
    "tpu.trace_start"() <{level = 10 : i32, message = "bqd,bkd->bqk"}> : () -> ()
    %cst_8 = arith.constant dense<0.000000e+00> : vector<2x16x16xf32>
    %23 = tpu.matmul %21, %22, %cst_8 {dimension_numbers = #tpu.dot_dimension_numbers<[2], [2], [1], [1], [0, 0, 0, 1, 1, 1], [0], [0]>} : vector<2x16x32xbf16>, vector<2x16x32xbf16>, vector<2x16x16xf32> -> vector<2x16x16xf32>
    "tpu.trace_stop"() : () -> ()
    %cst_9 = arith.constant dense<0xFF800000> : vector<2x16xf32>
    %24 = vector.multi_reduction <maximumf>, %23, %cst_9 [2] : vector<2x16x16xf32> to vector<2x16xf32>
    %25 = vector.shape_cast %24 : vector<2x16xf32> to vector<2x16x1xf32>
    %26 = vector.broadcast %25 : vector<2x16x1xf32> to vector<2x16x16xf32>
    %27 = arith.subf %23, %26 : vector<2x16x16xf32>
    %28 = math.exp %27 : vector<2x16x16xf32>
    %cst_10 = arith.constant dense<0.000000e+00> : vector<2x16xf32>
    %29 = vector.multi_reduction <add>, %28, %cst_10 [2] : vector<2x16x16xf32> to vector<2x16xf32>
    %30 = vector.shape_cast %29 : vector<2x16xf32> to vector<2x16x1xf32>
    %31 = tpu.reciprocal %30 {approx = true} : vector<2x16x1xf32> -> vector<2x16x1xf32>
    %32 = vector.broadcast %31 : vector<2x16x1xf32> to vector<2x16x16xf32>
    %33 = arith.mulf %28, %32 : vector<2x16x16xf32>
    %34 = arith.truncf %33 : vector<2x16x16xf32> to vector<2x16x16xbf16>
    %35 = vector.extract_strided_slice %20 {offsets = [0, 0, 0], sizes = [2, 16, 32], strides = [1, 1, 1]} : vector<2x16x128xbf16> to vector<2x16x32xbf16>
    "tpu.trace_start"() <{level = 10 : i32, message = "bqk,bkd->bqd"}> : () -> ()
    %cst_11 = arith.constant dense<0.000000e+00> : vector<2x16x32xf32>
    %36 = tpu.matmul %34, %35, %cst_11 {dimension_numbers = #tpu.dot_dimension_numbers<[2], [1], [1], [2], [0, 0, 0, 1, 1, 2], [0], [0]>} : vector<2x16x16xbf16>, vector<2x16x32xbf16>, vector<2x16x32xf32> -> vector<2x16x32xf32>
    "tpu.trace_stop"() : () -> ()
    %37 = vector.shape_cast %36 : vector<2x16x32xf32> to vector<32x32xf32>
    %38 = vector.extract_strided_slice %14 {offsets = [0, 0, 32], sizes = [2, 16, 32], strides = [1, 1, 1]} : vector<2x16x128xbf16> to vector<2x16x32xbf16>
    %39 = vector.extract_strided_slice %17 {offsets = [0, 0, 32], sizes = [2, 16, 32], strides = [1, 1, 1]} : vector<2x16x128xbf16> to vector<2x16x32xbf16>
    "tpu.trace_start"() <{level = 10 : i32, message = "bqd,bkd->bqk"}> : () -> ()
    %cst_12 = arith.constant dense<0.000000e+00> : vector<2x16x16xf32>
    %40 = tpu.matmul %38, %39, %cst_12 {dimension_numbers = #tpu.dot_dimension_numbers<[2], [2], [1], [1], [0, 0, 0, 1, 1, 1], [0], [0]>} : vector<2x16x32xbf16>, vector<2x16x32xbf16>, vector<2x16x16xf32> -> vector<2x16x16xf32>
    "tpu.trace_stop"() : () -> ()
    %cst_13 = arith.constant dense<0xFF800000> : vector<2x16xf32>
    %41 = vector.multi_reduction <maximumf>, %40, %cst_13 [2] : vector<2x16x16xf32> to vector<2x16xf32>
    %42 = vector.shape_cast %41 : vector<2x16xf32> to vector<2x16x1xf32>
    %43 = vector.broadcast %42 : vector<2x16x1xf32> to vector<2x16x16xf32>
    %44 = arith.subf %40, %43 : vector<2x16x16xf32>
    %45 = math.exp %44 : vector<2x16x16xf32>
    %cst_14 = arith.constant dense<0.000000e+00> : vector<2x16xf32>
    %46 = vector.multi_reduction <add>, %45, %cst_14 [2] : vector<2x16x16xf32> to vector<2x16xf32>
    %47 = vector.shape_cast %46 : vector<2x16xf32> to vector<2x16x1xf32>
    %48 = tpu.reciprocal %47 {approx = true} : vector<2x16x1xf32> -> vector<2x16x1xf32>
    %49 = vector.broadcast %48 : vector<2x16x1xf32> to vector<2x16x16xf32>
    %50 = arith.mulf %45, %49 : vector<2x16x16xf32>
    %51 = arith.truncf %50 : vector<2x16x16xf32> to vector<2x16x16xbf16>
    %52 = vector.extract_strided_slice %20 {offsets = [0, 0, 32], sizes = [2, 16, 32], strides = [1, 1, 1]} : vector<2x16x128xbf16> to vector<2x16x32xbf16>
    "tpu.trace_start"() <{level = 10 : i32, message = "bqk,bkd->bqd"}> : () -> ()
    %cst_15 = arith.constant dense<0.000000e+00> : vector<2x16x32xf32>
    %53 = tpu.matmul %51, %52, %cst_15 {dimension_numbers = #tpu.dot_dimension_numbers<[2], [1], [1], [2], [0, 0, 0, 1, 1, 2], [0], [0]>} : vector<2x16x16xbf16>, vector<2x16x32xbf16>, vector<2x16x32xf32> -> vector<2x16x32xf32>
    "tpu.trace_stop"() : () -> ()
    %54 = vector.shape_cast %53 : vector<2x16x32xf32> to vector<32x32xf32>
    %55 = vector.extract_strided_slice %14 {offsets = [0, 0, 64], sizes = [2, 16, 32], strides = [1, 1, 1]} : vector<2x16x128xbf16> to vector<2x16x32xbf16>
    %56 = vector.extract_strided_slice %17 {offsets = [0, 0, 64], sizes = [2, 16, 32], strides = [1, 1, 1]} : vector<2x16x128xbf16> to vector<2x16x32xbf16>
    "tpu.trace_start"() <{level = 10 : i32, message = "bqd,bkd->bqk"}> : () -> ()
    %cst_16 = arith.constant dense<0.000000e+00> : vector<2x16x16xf32>
    %57 = tpu.matmul %55, %56, %cst_16 {dimension_numbers = #tpu.dot_dimension_numbers<[2], [2], [1], [1], [0, 0, 0, 1, 1, 1], [0], [0]>} : vector<2x16x32xbf16>, vector<2x16x32xbf16>, vector<2x16x16xf32> -> vector<2x16x16xf32>
    "tpu.trace_stop"() : () -> ()
    %cst_17 = arith.constant dense<0xFF800000> : vector<2x16xf32>
    %58 = vector.multi_reduction <maximumf>, %57, %cst_17 [2] : vector<2x16x16xf32> to vector<2x16xf32>
    %59 = vector.shape_cast %58 : vector<2x16xf32> to vector<2x16x1xf32>
    %60 = vector.broadcast %59 : vector<2x16x1xf32> to vector<2x16x16xf32>
    %61 = arith.subf %57, %60 : vector<2x16x16xf32>
    %62 = math.exp %61 : vector<2x16x16xf32>
    %cst_18 = arith.constant dense<0.000000e+00> : vector<2x16xf32>
    %63 = vector.multi_reduction <add>, %62, %cst_18 [2] : vector<2x16x16xf32> to vector<2x16xf32>
    %64 = vector.shape_cast %63 : vector<2x16xf32> to vector<2x16x1xf32>
    %65 = tpu.reciprocal %64 {approx = true} : vector<2x16x1xf32> -> vector<2x16x1xf32>
    %66 = vector.broadcast %65 : vector<2x16x1xf32> to vector<2x16x16xf32>
    %67 = arith.mulf %62, %66 : vector<2x16x16xf32>
    %68 = arith.truncf %67 : vector<2x16x16xf32> to vector<2x16x16xbf16>
    %69 = vector.extract_strided_slice %20 {offsets = [0, 0, 64], sizes = [2, 16, 32], strides = [1, 1, 1]} : vector<2x16x128xbf16> to vector<2x16x32xbf16>
    "tpu.trace_start"() <{level = 10 : i32, message = "bqk,bkd->bqd"}> : () -> ()
    %cst_19 = arith.constant dense<0.000000e+00> : vector<2x16x32xf32>
    %70 = tpu.matmul %68, %69, %cst_19 {dimension_numbers = #tpu.dot_dimension_numbers<[2], [1], [1], [2], [0, 0, 0, 1, 1, 2], [0], [0]>} : vector<2x16x16xbf16>, vector<2x16x32xbf16>, vector<2x16x32xf32> -> vector<2x16x32xf32>
    "tpu.trace_stop"() : () -> ()
    %71 = vector.shape_cast %70 : vector<2x16x32xf32> to vector<32x32xf32>
    %72 = vector.extract_strided_slice %14 {offsets = [0, 0, 96], sizes = [2, 16, 32], strides = [1, 1, 1]} : vector<2x16x128xbf16> to vector<2x16x32xbf16>
    %73 = vector.extract_strided_slice %17 {offsets = [0, 0, 96], sizes = [2, 16, 32], strides = [1, 1, 1]} : vector<2x16x128xbf16> to vector<2x16x32xbf16>
    "tpu.trace_start"() <{level = 10 : i32, message = "bqd,bkd->bqk"}> : () -> ()
    %cst_20 = arith.constant dense<0.000000e+00> : vector<2x16x16xf32>
    %74 = tpu.matmul %72, %73, %cst_20 {dimension_numbers = #tpu.dot_dimension_numbers<[2], [2], [1], [1], [0, 0, 0, 1, 1, 1], [0], [0]>} : vector<2x16x32xbf16>, vector<2x16x32xbf16>, vector<2x16x16xf32> -> vector<2x16x16xf32>
    "tpu.trace_stop"() : () -> ()
    %cst_21 = arith.constant dense<0xFF800000> : vector<2x16xf32>
    %75 = vector.multi_reduction <maximumf>, %74, %cst_21 [2] : vector<2x16x16xf32> to vector<2x16xf32>
    %76 = vector.shape_cast %75 : vector<2x16xf32> to vector<2x16x1xf32>
    %77 = vector.broadcast %76 : vector<2x16x1xf32> to vector<2x16x16xf32>
    %78 = arith.subf %74, %77 : vector<2x16x16xf32>
    %79 = math.exp %78 : vector<2x16x16xf32>
    %cst_22 = arith.constant dense<0.000000e+00> : vector<2x16xf32>
    %80 = vector.multi_reduction <add>, %79, %cst_22 [2] : vector<2x16x16xf32> to vector<2x16xf32>
    %81 = vector.shape_cast %80 : vector<2x16xf32> to vector<2x16x1xf32>
    %82 = tpu.reciprocal %81 {approx = true} : vector<2x16x1xf32> -> vector<2x16x1xf32>
    %83 = vector.broadcast %82 : vector<2x16x1xf32> to vector<2x16x16xf32>
    %84 = arith.mulf %79, %83 : vector<2x16x16xf32>
    %85 = arith.truncf %84 : vector<2x16x16xf32> to vector<2x16x16xbf16>
    %86 = vector.extract_strided_slice %20 {offsets = [0, 0, 96], sizes = [2, 16, 32], strides = [1, 1, 1]} : vector<2x16x128xbf16> to vector<2x16x32xbf16>
    "tpu.trace_start"() <{level = 10 : i32, message = "bqk,bkd->bqd"}> : () -> ()
    %cst_23 = arith.constant dense<0.000000e+00> : vector<2x16x32xf32>
    %87 = tpu.matmul %85, %86, %cst_23 {dimension_numbers = #tpu.dot_dimension_numbers<[2], [1], [1], [2], [0, 0, 0, 1, 1, 2], [0], [0]>} : vector<2x16x16xbf16>, vector<2x16x32xbf16>, vector<2x16x32xf32> -> vector<2x16x32xf32>
    "tpu.trace_stop"() : () -> ()
    %88 = vector.shape_cast %87 : vector<2x16x32xf32> to vector<32x32xf32>
    %89 = tpu.concatenate %37, %54, %71, %88 in 1 : vector<32x32xf32>, vector<32x32xf32>, vector<32x32xf32>, vector<32x32xf32> -> vector<32x128xf32>
    %90 = arith.truncf %89 : vector<32x128xf32> to vector<32x128xbf16>
    %c0_24 = arith.constant 0 : index
    %c0_25 = arith.constant 0 : index
    %c0_26 = arith.constant 0 : index
    %91 = vector.load %arg12[%c0_24, %c0_25, %c0_26] : memref<1x128x128xbf16, #tpu.memory_space<vmem>>, vector<1x128x128xbf16>
    %92 = vector.shape_cast %91 : vector<1x128x128xbf16> to vector<128x128xbf16>
    %cst_27 = arith.constant dense<0.000000e+00> : vector<32x128xf32>
    %93 = tpu.matmul %90, %92, %cst_27 {dimension_numbers = #tpu.dot_dimension_numbers<[1], [0], [0], [1], [0, 0, 1, 1], [], []>} : vector<32x128xbf16>, vector<128x128xbf16>, vector<32x128xf32> -> vector<32x128xf32>
    %c0_28 = arith.constant 0 : index
    %c0_29 = arith.constant 0 : index
    %c0_30 = arith.constant 0 : index
    %94 = vector.load %arg13[%c0_28, %c0_29, %c0_30] : memref<1x1x128xf32, #tpu.memory_space<vmem>>, vector<1x1x128xf32>
    %95 = vector.shape_cast %94 : vector<1x1x128xf32> to vector<1x128xf32>
    %96 = vector.broadcast %95 : vector<1x128xf32> to vector<32x128xf32>
    %97 = arith.addf %93, %96 : vector<32x128xf32>
    %98 = arith.addf %3, %97 : vector<32x128xf32>
    %c0_31 = arith.constant 0 : index
    %c0_32 = arith.constant 0 : index
    %c0_33 = arith.constant 0 : index
    %99 = vector.load %arg14[%c0_31, %c0_32, %c0_33] : memref<1x1x128xf32, #tpu.memory_space<vmem>>, vector<1x1x128xf32>
    %100 = vector.shape_cast %99 : vector<1x1x128xf32> to vector<1x128xf32>
    %c0_34 = arith.constant 0 : index
    %c0_35 = arith.constant 0 : index
    %c0_36 = arith.constant 0 : index
    %101 = vector.load %arg15[%c0_34, %c0_35, %c0_36] : memref<1x1x128xf32, #tpu.memory_space<vmem>>, vector<1x1x128xf32>
    %102 = vector.shape_cast %101 : vector<1x1x128xf32> to vector<1x128xf32>
    %cst_37 = arith.constant dense<0.000000e+00> : vector<32xf32>
    %103 = vector.multi_reduction <add>, %98, %cst_37 [1] : vector<32x128xf32> to vector<32xf32>
    %104 = vector.shape_cast %103 : vector<32xf32> to vector<32x1xf32>
    %cst_38 = arith.constant 1.280000e+02 : f32
    %105 = vector.broadcast %cst_38 : f32 to vector<32x1xf32>
    %106 = arith.divf %104, %105 : vector<32x1xf32>
    %107 = vector.broadcast %106 : vector<32x1xf32> to vector<32x128xf32>
    %108 = arith.subf %98, %107 : vector<32x128xf32>
    %109 = arith.mulf %108, %108 : vector<32x128xf32>
    %cst_39 = arith.constant dense<0.000000e+00> : vector<32xf32>
    %110 = vector.multi_reduction <add>, %109, %cst_39 [1] : vector<32x128xf32> to vector<32xf32>
    %111 = vector.shape_cast %110 : vector<32xf32> to vector<32x1xf32>
    %cst_40 = arith.constant 1.280000e+02 : f32
    %112 = vector.broadcast %cst_40 : f32 to vector<32x1xf32>
    %113 = arith.divf %111, %112 : vector<32x1xf32>
    %114 = vector.broadcast %106 : vector<32x1xf32> to vector<32x128xf32>
    %115 = arith.subf %98, %114 : vector<32x128xf32>
    %cst_41 = arith.constant 9.99999974E-6 : f32
    %116 = vector.broadcast %cst_41 : f32 to vector<32x1xf32>
    %117 = arith.addf %113, %116 : vector<32x1xf32>
    %118 = math.rsqrt %117 : vector<32x1xf32>
    %119 = vector.broadcast %118 : vector<32x1xf32> to vector<32x128xf32>
    %120 = arith.mulf %115, %119 : vector<32x128xf32>
    %121 = vector.broadcast %100 : vector<1x128xf32> to vector<32x128xf32>
    %122 = arith.mulf %120, %121 : vector<32x128xf32>
    %123 = vector.broadcast %102 : vector<1x128xf32> to vector<32x128xf32>
    %124 = arith.addf %122, %123 : vector<32x128xf32>
    %125 = arith.truncf %124 : vector<32x128xf32> to vector<32x128xbf16>
    %c0_42 = arith.constant 0 : index
    %c0_43 = arith.constant 0 : index
    %c0_44 = arith.constant 0 : index
    %126 = vector.load %arg18[%c0_42, %c0_43, %c0_44] : memref<1x128x256xbf16, #tpu.memory_space<vmem>>, vector<1x128x256xbf16>
    %127 = vector.shape_cast %126 : vector<1x128x256xbf16> to vector<128x256xbf16>
    %cst_45 = arith.constant dense<0.000000e+00> : vector<32x256xf32>
    %128 = tpu.matmul %125, %127, %cst_45 {dimension_numbers = #tpu.dot_dimension_numbers<[1], [0], [0], [1], [0, 0, 1, 1], [], []>} : vector<32x128xbf16>, vector<128x256xbf16>, vector<32x256xf32> -> vector<32x256xf32>
    %c0_46 = arith.constant 0 : index
    %c0_47 = arith.constant 0 : index
    %c0_48 = arith.constant 0 : index
    %129 = vector.load %arg19[%c0_46, %c0_47, %c0_48] : memref<1x1x256xf32, #tpu.memory_space<vmem>>, vector<1x1x256xf32>
    %130 = vector.shape_cast %129 : vector<1x1x256xf32> to vector<1x256xf32>
    %131 = vector.broadcast %130 : vector<1x256xf32> to vector<32x256xf32>
    %132 = arith.addf %128, %131 : vector<32x256xf32>
    %cst_49 = arith.constant 0.000000e+00 : f32
    %133 = vector.broadcast %cst_49 : f32 to vector<32x256xf32>
    %134 = arith.maximumf %132, %133 : vector<32x256xf32>
    %135 = arith.truncf %134 : vector<32x256xf32> to vector<32x256xbf16>
    %c0_50 = arith.constant 0 : index
    %c0_51 = arith.constant 0 : index
    %c0_52 = arith.constant 0 : index
    %136 = vector.load %arg20[%c0_50, %c0_51, %c0_52] : memref<1x256x128xbf16, #tpu.memory_space<vmem>>, vector<1x256x128xbf16>
    %137 = vector.shape_cast %136 : vector<1x256x128xbf16> to vector<256x128xbf16>
    %cst_53 = arith.constant dense<0.000000e+00> : vector<32x128xf32>
    %138 = tpu.matmul %135, %137, %cst_53 {dimension_numbers = #tpu.dot_dimension_numbers<[1], [0], [0], [1], [0, 0, 1, 1], [], []>} : vector<32x256xbf16>, vector<256x128xbf16>, vector<32x128xf32> -> vector<32x128xf32>
    %c0_54 = arith.constant 0 : index
    %c0_55 = arith.constant 0 : index
    %c0_56 = arith.constant 0 : index
    %139 = vector.load %arg21[%c0_54, %c0_55, %c0_56] : memref<1x1x128xf32, #tpu.memory_space<vmem>>, vector<1x1x128xf32>
    %140 = vector.shape_cast %139 : vector<1x1x128xf32> to vector<1x128xf32>
    %141 = vector.broadcast %140 : vector<1x128xf32> to vector<32x128xf32>
    %142 = arith.addf %138, %141 : vector<32x128xf32>
    %143 = arith.addf %124, %142 : vector<32x128xf32>
    %c0_57 = arith.constant 0 : index
    %c0_58 = arith.constant 0 : index
    %c0_59 = arith.constant 0 : index
    %144 = vector.load %arg16[%c0_57, %c0_58, %c0_59] : memref<1x1x128xf32, #tpu.memory_space<vmem>>, vector<1x1x128xf32>
    %145 = vector.shape_cast %144 : vector<1x1x128xf32> to vector<1x128xf32>
    %c0_60 = arith.constant 0 : index
    %c0_61 = arith.constant 0 : index
    %c0_62 = arith.constant 0 : index
    %146 = vector.load %arg17[%c0_60, %c0_61, %c0_62] : memref<1x1x128xf32, #tpu.memory_space<vmem>>, vector<1x1x128xf32>
    %147 = vector.shape_cast %146 : vector<1x1x128xf32> to vector<1x128xf32>
    %cst_63 = arith.constant dense<0.000000e+00> : vector<32xf32>
    %148 = vector.multi_reduction <add>, %143, %cst_63 [1] : vector<32x128xf32> to vector<32xf32>
    %149 = vector.shape_cast %148 : vector<32xf32> to vector<32x1xf32>
    %cst_64 = arith.constant 1.280000e+02 : f32
    %150 = vector.broadcast %cst_64 : f32 to vector<32x1xf32>
    %151 = arith.divf %149, %150 : vector<32x1xf32>
    %152 = vector.broadcast %151 : vector<32x1xf32> to vector<32x128xf32>
    %153 = arith.subf %143, %152 : vector<32x128xf32>
    %154 = arith.mulf %153, %153 : vector<32x128xf32>
    %cst_65 = arith.constant dense<0.000000e+00> : vector<32xf32>
    %155 = vector.multi_reduction <add>, %154, %cst_65 [1] : vector<32x128xf32> to vector<32xf32>
    %156 = vector.shape_cast %155 : vector<32xf32> to vector<32x1xf32>
    %cst_66 = arith.constant 1.280000e+02 : f32
    %157 = vector.broadcast %cst_66 : f32 to vector<32x1xf32>
    %158 = arith.divf %156, %157 : vector<32x1xf32>
    %159 = vector.broadcast %151 : vector<32x1xf32> to vector<32x128xf32>
    %160 = arith.subf %143, %159 : vector<32x128xf32>
    %cst_67 = arith.constant 9.99999974E-6 : f32
    %161 = vector.broadcast %cst_67 : f32 to vector<32x1xf32>
    %162 = arith.addf %158, %161 : vector<32x1xf32>
    %163 = math.rsqrt %162 : vector<32x1xf32>
    %164 = vector.broadcast %163 : vector<32x1xf32> to vector<32x128xf32>
    %165 = arith.mulf %160, %164 : vector<32x128xf32>
    %166 = vector.broadcast %145 : vector<1x128xf32> to vector<32x128xf32>
    %167 = arith.mulf %165, %166 : vector<32x128xf32>
    %168 = vector.broadcast %147 : vector<1x128xf32> to vector<32x128xf32>
    %169 = arith.addf %167, %168 : vector<32x128xf32>
    %c0_68 = arith.constant 0 : index
    %c0_69 = arith.constant 0 : index
    %170 = vector.load %arg23[%c0_68, %c0_69] : memref<32x128xf32, #tpu.memory_space<vmem>>, vector<32x128xf32>
    tpu.vector_store %arg23[%c0_68, %c0_69], %169 {strides = array<i32>} : memref<32x128xf32, #tpu.memory_space<vmem>>, vector<32x128xf32>,
    %c3_i32 = arith.constant 3 : i32
    %171 = arith.cmpi eq, %arg0, %c3_i32 : i32
    %172 = arith.extui %171 : i1 to i32
    %c0_i32_70 = arith.constant 0 : i32
    %173 = arith.cmpi ne, %172, %c0_i32_70 : i32
    scf.if %173 {
      %174 = arith.truncf %169 : vector<32x128xf32> to vector<32x128xbf16>
      %c0_71 = arith.constant 0 : index
      %c0_72 = arith.constant 0 : index
      %175 = vector.load %arg8[%c0_71, %c0_72] : memref<128x32xbf16, #tpu.memory_space<vmem>>, vector<128x32xbf16>
      %cst_73 = arith.constant dense<0.000000e+00> : vector<32x32xf32>
      %176 = tpu.matmul %174, %175, %cst_73 {dimension_numbers = #tpu.dot_dimension_numbers<[1], [0], [0], [1], [0, 0, 1, 1], [], []>} : vector<32x128xbf16>, vector<128x32xbf16>, vector<32x32xf32> -> vector<32x32xf32>
      %c0_74 = arith.constant 0 : index
      %c0_75 = arith.constant 0 : index
      %177 = vector.load %arg9[%c0_74, %c0_75] : memref<1x32xf32, #tpu.memory_space<vmem>>, vector<1x32xf32>
      %178 = vector.broadcast %177 : vector<1x32xf32> to vector<32x32xf32>
      %179 = arith.addf %176, %178 : vector<32x32xf32>
      %180 = tpu.iota {dimensions = array<i32: 1>} : vector<32x32xi32>
      %c0_76 = arith.constant 0 : index
      %c0_77 = arith.constant 0 : index
      %181 = vector.load %arg3[%c0_76, %c0_77] : memref<32x1xi32, #tpu.memory_space<vmem>>, vector<32x1xi32>
      %c31_i32 = arith.constant 31 : i32
      %182 = vector.broadcast %c31_i32 : i32 to vector<32x32xi32>
      %183 = arith.cmpi eq, %180, %182 : vector<32x32xi32>
      %cst_78 = arith.constant -1.000000e+09 : f32
      %cst_79 = arith.constant 0.000000e+00 : f32
      %184 = vector.broadcast %cst_78 : f32 to vector<32x32xf32>
      %185 = vector.broadcast %cst_79 : f32 to vector<32x32xf32>
      %186 = arith.select %183, %184, %185 : vector<32x32xi1>, vector<32x32xf32>
      %187 = arith.addf %179, %186 : vector<32x32xf32>
      %cst_80 = arith.constant dense<0xFF800000> : vector<32xf32>
      %188 = vector.multi_reduction <maximumf>, %187, %cst_80 [1] : vector<32x32xf32> to vector<32xf32>
      %189 = vector.shape_cast %188 : vector<32xf32> to vector<32x1xf32>
      %190 = vector.broadcast %189 : vector<32x1xf32> to vector<32x32xf32>
      %191 = arith.subf %187, %190 : vector<32x32xf32>
      %192 = math.exp %191 : vector<32x32xf32>
      %cst_81 = arith.constant dense<0.000000e+00> : vector<32xf32>
      %193 = vector.multi_reduction <add>, %192, %cst_81 [1] : vector<32x32xf32> to vector<32xf32>
      %194 = vector.shape_cast %193 : vector<32xf32> to vector<32x1xf32>
      %195 = math.log %194 : vector<32x1xf32>
      %196 = arith.addf %189, %195 : vector<32x1xf32>
      %197 = vector.broadcast %196 : vector<32x1xf32> to vector<32x32xf32>
      %198 = arith.subf %187, %197 : vector<32x32xf32>
      %c31_i32_82 = arith.constant 31 : i32
      %199 = vector.broadcast %c31_i32_82 : i32 to vector<32x1xi32>
      %200 = arith.cmpi ne, %181, %199 : vector<32x1xi32>
      %201 = vector.broadcast %181 : vector<32x1xi32> to vector<32x32xi32>
      %202 = arith.cmpi eq, %180, %201 : vector<32x32xi32>
      %cst_83 = arith.constant 0.000000e+00 : f32
      %cst_84 = arith.constant -1.000000e+09 : f32
      %203 = vector.broadcast %cst_83 : f32 to vector<32x32xf32>
      %204 = vector.broadcast %cst_84 : f32 to vector<32x32xf32>
      %205 = arith.select %202, %203, %204 : vector<32x32xi1>, vector<32x32xf32>
      %206 = vector.shape_cast %200 : vector<32x1xi1> to vector<32x1xi1>
      %207 = vector.broadcast %206 : vector<32x1xi1> to vector<32x32xi1>
      %208 = arith.select %207, %205, %198 : vector<32x32xi1>, vector<32x32xf32>
      %c0_85 = arith.constant 0 : index
      %c0_86 = arith.constant 0 : index
      %209 = vector.load %arg22[%c0_85, %c0_86] : memref<32x32xf32, #tpu.memory_space<vmem>>, vector<32x32xf32>
      tpu.vector_store %arg22[%c0_85, %c0_86], %208 {strides = array<i32>} : memref<32x32xf32, #tpu.memory_space<vmem>>, vector<32x32xf32>,
    } else {
    }
    return
  }
  func.func @transform_0(%arg0: i32) -> (i32, i32, i32) {
    %c0_i32 = arith.constant 0 : i32
    %c0_i32_0 = arith.constant 0 : i32
    %c0_i32_1 = arith.constant 0 : i32
    %c0_i32_2 = arith.constant 0 : i32
    return %c0_i32, %c0_i32_0, %c0_i32_1 : i32, i32, i32
  }
  func.func @transform_1(%arg0: i32) -> (i32, i32) {
    %c0_i32 = arith.constant 0 : i32
    %c0_i32_0 = arith.constant 0 : i32
    %c0_i32_1 = arith.constant 0 : i32
    return %c0_i32, %c0_i32_0 : i32, i32
  }
  func.func @transform_2(%arg0: i32) -> (i32, i32) {
    %c0_i32 = arith.constant 0 : i32
    %c0_i32_0 = arith.constant 0 : i32
    %c0_i32_1 = arith.constant 0 : i32
    return %c0_i32, %c0_i32_0 : i32, i32
  }
  func.func @transform_3(%arg0: i32) -> (i32, i32) {
    %c0_i32 = arith.constant 0 : i32
    %c0_i32_0 = arith.constant 0 : i32
    %c0_i32_1 = arith.constant 0 : i32
    return %c0_i32, %c0_i32_0 : i32, i32
  }
  func.func @transform_4(%arg0: i32) -> (i32, i32) {
    %c0_i32 = arith.constant 0 : i32
    %c0_i32_0 = arith.constant 0 : i32
    %c0_i32_1 = arith.constant 0 : i32
    return %c0_i32, %c0_i32_0 : i32, i32
  }
  func.func @transform_5(%arg0: i32) -> (i32, i32) {
    %c0_i32 = arith.constant 0 : i32
    %c0_i32_0 = arith.constant 0 : i32
    %c0_i32_1 = arith.constant 0 : i32
    return %c0_i32, %c0_i32_0 : i32, i32
  }
  func.func @transform_6(%arg0: i32) -> (i32, i32) {
    %c0_i32 = arith.constant 0 : i32
    %c0_i32_0 = arith.constant 0 : i32
    %c0_i32_1 = arith.constant 0 : i32
    return %c0_i32, %c0_i32_0 : i32, i32
  }
  func.func @transform_7(%arg0: i32) -> (i32, i32) {
    %c0_i32 = arith.constant 0 : i32
    %c0_i32_0 = arith.constant 0 : i32
    %c0_i32_1 = arith.constant 0 : i32
    return %c0_i32, %c0_i32_0 : i32, i32
  }
  func.func @transform_8(%arg0: i32) -> (i32, i32) {
    %c0_i32 = arith.constant 0 : i32
    %c0_i32_0 = arith.constant 0 : i32
    %c0_i32_1 = arith.constant 0 : i32
    return %c0_i32, %c0_i32_0 : i32, i32
  }
  func.func @transform_9(%arg0: i32) -> (i32, i32, i32) {
    %c0_i32 = arith.constant 0 : i32
    %c0_i32_0 = arith.constant 0 : i32
    %c0_i32_1 = arith.constant 0 : i32
    return %arg0, %c0_i32, %c0_i32_0 : i32, i32, i32
  }
  func.func @transform_10(%arg0: i32) -> (i32, i32, i32) {
    %c0_i32 = arith.constant 0 : i32
    %c0_i32_0 = arith.constant 0 : i32
    %c0_i32_1 = arith.constant 0 : i32
    return %arg0, %c0_i32, %c0_i32_0 : i32, i32, i32
  }
  func.func @transform_11(%arg0: i32) -> (i32, i32, i32) {
    %c0_i32 = arith.constant 0 : i32
    %c0_i32_0 = arith.constant 0 : i32
    %c0_i32_1 = arith.constant 0 : i32
    return %arg0, %c0_i32, %c0_i32_0 : i32, i32, i32
  }
  func.func @transform_12(%arg0: i32) -> (i32, i32, i32) {
    %c0_i32 = arith.constant 0 : i32
    %c0_i32_0 = arith.constant 0 : i32
    %c0_i32_1 = arith.constant 0 : i32
    return %arg0, %c0_i32, %c0_i32_0 : i32, i32, i32
  }
  func.func @transform_13(%arg0: i32) -> (i32, i32, i32) {
    %c0_i32 = arith.constant 0 : i32
    %c0_i32_0 = arith.constant 0 : i32
    %c0_i32_1 = arith.constant 0 : i32
    return %arg0, %c0_i32, %c0_i32_0 : i32, i32, i32
  }
  func.func @transform_14(%arg0: i32) -> (i32, i32, i32) {
    %c0_i32 = arith.constant 0 : i32
    %c0_i32_0 = arith.constant 0 : i32
    %c0_i32_1 = arith.constant 0 : i32
    return %arg0, %c0_i32, %c0_i32_0 : i32, i32, i32
  }
  func.func @transform_15(%arg0: i32) -> (i32, i32, i32) {
    %c0_i32 = arith.constant 0 : i32
    %c0_i32_0 = arith.constant 0 : i32
    %c0_i32_1 = arith.constant 0 : i32
    return %arg0, %c0_i32, %c0_i32_0 : i32, i32, i32
  }
  func.func @transform_16(%arg0: i32) -> (i32, i32, i32) {
    %c0_i32 = arith.constant 0 : i32
    %c0_i32_0 = arith.constant 0 : i32
    %c0_i32_1 = arith.constant 0 : i32
    return %arg0, %c0_i32, %c0_i32_0 : i32, i32, i32
  }
  func.func @transform_17(%arg0: i32) -> (i32, i32, i32) {
    %c0_i32 = arith.constant 0 : i32
    %c0_i32_0 = arith.constant 0 : i32
    %c0_i32_1 = arith.constant 0 : i32
    return %arg0, %c0_i32, %c0_i32_0 : i32, i32, i32
  }
  func.func @transform_18(%arg0: i32) -> (i32, i32, i32) {
    %c0_i32 = arith.constant 0 : i32
    %c0_i32_0 = arith.constant 0 : i32
    %c0_i32_1 = arith.constant 0 : i32
    return %arg0, %c0_i32, %c0_i32_0 : i32, i32, i32
  }
  func.func @transform_19(%arg0: i32) -> (i32, i32, i32) {
    %c0_i32 = arith.constant 0 : i32
    %c0_i32_0 = arith.constant 0 : i32
    %c0_i32_1 = arith.constant 0 : i32
    return %arg0, %c0_i32, %c0_i32_0 : i32, i32, i32
  }
  func.func @transform_20(%arg0: i32) -> (i32, i32, i32) {
    %c0_i32 = arith.constant 0 : i32
    %c0_i32_0 = arith.constant 0 : i32
    %c0_i32_1 = arith.constant 0 : i32
    return %arg0, %c0_i32, %c0_i32_0 : i32, i32, i32
  }
  func.func @transform_21(%arg0: i32) -> (i32, i32) {
    %c0_i32 = arith.constant 0 : i32
    %c0_i32_0 = arith.constant 0 : i32
    %c0_i32_1 = arith.constant 0 : i32
    return %c0_i32, %c0_i32_0 : i32, i32
  }
}

</mosaic_0001>

<bundles_post_ra>
// kernel: unmasker_forward.1
= control target key start
LH: loop header
LB: loop body
LE: loop exit
PB: predicated region body
PF: predicated region fallthrough
CT: control target
= control target key end

     0   :  { %s4842_s0 = inlined_call_operand.vmem [shape: f32[2,16,128], index: 0, kind: input, shape index: {}]   ;;  %s4843_s1 = inlined_call_operand.vmem [shape: f32[2,16], index: 1, kind: input, shape index: {}]   ;;  %s4844_s2 = inlined_call_operand.vmem [shape: s32[32,1], index: 2, kind: input, shape index: {}]   ;;  %s4845_s3 = inlined_call_operand.vmem [shape: bf16[16,128], index: 3, kind: input, shape index: {}]   ;;  %s4846_s4 = inlined_call_operand.vmem [shape: f32[1,128], index: 4, kind: input, shape index: {}, may-alias: {4,6}]   ;;  %s4847_s5 = inlined_call_operand.vmem [shape: bf16[128,128], index: 5, kind: input, shape index: {}]   ;;  %s4848_s6 = inlined_call_operand.vmem [shape: f32[1,128], index: 6, kind: input, shape index: {}, may-alias: {4,6}]   ;;  %s4849_s7 = inlined_call_operand.vmem [shape: bf16[128,32], index: 7, kind: input, shape index: {}]   ;;  %s4850_s8 = inlined_call_operand.vmem [shape: f32[1,32], index: 8, kind: input, shape index: {}]   ;;  %s4851_s9 = inlined_call_operand.vmem [shape: bf16[4,128,384], index: 9, kind: input, shape index: {}]   ;;  %s4852_s10 = inlined_call_operand.vmem [shape: f32[4,1,384], index: 10, kind: input, shape index: {}]   ;;  %s4853_s11 = inlined_call_operand.vmem [shape: bf16[4,128,128], index: 11, kind: input, shape index: {}]   ;;  %s4854_s12 = inlined_call_operand.vmem [shape: f32[4,1,128], index: 12, kind: input, shape index: {}, may-alias: {12,14,16,20}]   ;;  %s4855_s13 = inlined_call_operand.vmem [shape: f32[4,1,128], index: 13, kind: input, shape index: {}, may-alias: {13,15}]   ;;  %s4856_s14 = inlined_call_operand.vmem [shape: f32[4,1,128], index: 14, kind: input, shape index: {}, may-alias: {12,14,16,20}]   ;;  %s4857_s15 = inlined_call_operand.vmem [shape: f32[4,1,128], index: 15, kind: input, shape index: {}, may-alias: {13,15}]   ;;  %s4858_s16 = inlined_call_operand.vmem [shape: f32[4,1,128], index: 16, kind: input, shape index: {}, may-alias: {12,14,16,20}]   ;;  %s4859_s17 = inlined_call_operand.vmem [shape: bf16[4,128,256], index: 17, kind: input, shape index: {}]   ;;  %s4860_s18 = inlined_call_operand.vmem [shape: f32[4,1,256], index: 18, kind: input, shape index: {}]   ;;  %s4861_s19 = inlined_call_operand.vmem [shape: bf16[4,256,128], index: 19, kind: input, shape index: {}]   ;;  %s4862_s20 = inlined_call_operand.vmem [shape: f32[4,1,128], index: 20, kind: input, shape index: {}, may-alias: {12,14,16,20}]   ;;  %s4863_s21 = inlined_call_operand.hbm [shape: f32[32,32], index: 21, kind: output, shape index: {}]  }
   0x1   :  { %4870 = sst [smem:[#allocation7_spill]] %s4842_s0 }
   0x2   :  { %4871 = sst [smem:[#allocation8_spill]] %s4843_s1 }
   0x3   :  { %4872 = sst [smem:[#allocation9_spill]] %s4844_s2 }
   0x4   :  { %4873 = sst [smem:[#allocation10_spill]] %s4845_s3 }
   0x5   :  { %4874 = sst [smem:[#allocation11_spill]] %s4846_s4 }
   0x6   :  { %4875 = sst [smem:[#allocation12_spill]] %s4847_s5 }
   0x7   :  { %4876 = sst [smem:[#allocation13_spill]] %s4848_s6 }
   0x8   :  { %4877 = sst [smem:[#allocation14_spill]] %s4849_s7 }
   0x9   :  { %4878 = sst [smem:[#allocation15_spill]] %s4850_s8 }
   0xa   :  { %4879 = sst [smem:[#allocation16_spill]] %s4851_s9 }
   0xb   :  { %4880 = sst [smem:[#allocation17_spill]] %s4853_s11 }
   0xc   :  { %4881 = sst [smem:[#allocation18_spill]] %s4863_s21 }
   0xd   :  { %26 = vsyncpa [#allocation4], 0  ;;  %s4235_s2 = smov 0  }
   0xe LB: > { %4882 = sst [smem:[#allocation6_spill]] %s4108_s2  ;;  %s4241_s25 = sadd.s32 4294967295, %s4108_s2   ;;  %s4108_s2 = sphi %s4235_s2, %s32_s2  }
   0xf   : > { %p3399_p0 = scmp.ge.s32.totalorder %s4108_s2, 1  ;;  %p679_p1 = scmp.lt.s32.totalorder %s4108_s2, 5 }
  0x11   : > { %p680_p2 = pnand %p3399_p0, %p679_p1 }
  0x12   : > { %p775_p3 = scmp.lt.s32.totalorder (!%p680_p2), %s4241_s25, 3  ;;  %s4883_s11 = sld [smem:[#allocation17_spill]] (!%p680_p2) }
  0x13   : > { %683 = sbr.rel (%p680_p2) target bundleno = 5227 (0x146b), region = 104  ;;  %s4884_s9 = sld [smem:[#allocation16_spill]] (!%p680_p2) }
  0x14   : > { %p3408_p4 = scmp.ne.s32.totalorder (!%p680_p2), %s4241_s25, 0 }
  0x1a   : > { %s4247_s26 = scalar_select %p775_p3, %s4241_s25, 3 }
  0x1b   : > { %s4885_s1 = sld [smem:[#allocation10_spill]] (!%p3408_p4)  ;;  %v4110_v1 = vmov (!%p3408_p4), 0.0   ;;  %s4886_s7 = sld [smem:[#allocation8_spill]] (!%p3408_p4)  ;;  %vm843_vm0 = vcmask (!%p3408_p4), 130048   ;;  %vm4111_vm1 = vmmov (!%p3408_p4), 0   ;;  %v1014_v26 = vlaneseq (!%p3408_p4) }
  0x1c   : > { %s3808_s27 = smul.u32 192, %s4247_s26  ;;  %s3522_s3 = sshll.u32 %s4247_s26, 6  ;;  %3626 = vmatprep.subr.bf16.mxu0 (!%p3408_p4), %v4110_v1  ;;  %3632 = vmatprep.subr.bf16.mxu1 (!%p3408_p4), %v4110_v1  ;;  %v4112_v24 = vmov (!%p3408_p4), 1966171168  }
  0x1d   : > { %s3809_s28 = smul.u32 3, %s4247_s26  ;;  %s4255_s4 = scalar_lea.vmem %s4883_s11, %s3522_s3  ;;  %3628 = vmatprep.mubr.msk.bf16.mxu0 (!%p3408_p4), %vm4111_vm1, %v4110_v1  ;;  %3648 = vmatprep.mubr.msk.bf16.mxu1 (!%p3408_p4), %vm4111_vm1, %v4110_v1  ;;  %v1012_v25 = vunpack.c.l.s4 (!%p3408_p4), %v4112_v24  ;;  %v1015_v28 = vshrl.u32 (!%p3408_p4), %v1014_v26, 7 }
  0x1e   : > { %s4260_s22 = scalar_lea.vmem %s4884_s9, %s3808_s27  ;;  %s800_s5 = scalar_lea.vmem %s4857_s15, %s4247_s26 }
  0x1f   : > { %s4269_s8 = scalar_lea.vmem %s4852_s10, %s3809_s28  ;;  %s3523_s24 = sshll.u32 %s4247_s26, 7  ;;  %v1013_v27 = vunpack.c.0.s8 (!%p3408_p4), %v1012_v25  ;;  %v1035_v36 = vsub.s32 (!%p3408_p4), 0, %v1015_v28 }
  0x20   : > { %s4291_s28 = scalar_lea.vmem %s4859_s17, %s3523_s24  ;;  %s3405_s6 = sshll.u32 %s4247_s26, 1 }
  0x21   : > { %s4297_s3 = scalar_lea.vmem %s4860_s18, %s3405_s6  ;;  %s4302_s30 = scalar_lea.vmem %s4861_s19, %s3523_s24  ;;  %v3839_v0 = vld [vmem:[%s4885_s1] sm:$0xff] (!%p3408_p4)   ;;  %v1016_v30 = vsub.s32 (!%p3408_p4), %v1013_v27, %v1015_v28 }
  0x22   : > { %s820_s23 = scalar_lea.vmem %s4862_s20, %s4247_s26  ;;  %825 = sbr.rel (%p3408_p4) target bundleno = 506 (0x1fa), region = 108  ;;  %v826_v2 = vld [vmem:[%s4886_s7] sm:$0x3] (!%p3408_p4)  ;;  %3627 = vmatpush3.bf16.msra.mxu0 (!%p3408_p4), %v3839_v0 }
  0x23   : > { %v827_v3 = vpack.c.bf16 (!%p3408_p4), %v826_v2, %v826_v2  ;;  %s4887_s0 = sld [smem:[#allocation12_spill]] (!%p3408_p4)  ;;  %s4888_s6 = sld [smem:[#allocation11_spill]] (!%p3408_p4) }
  0x24   : > { %s4889_s24 = sld [smem:[#allocation13_spill]] (!%p3408_p4)  ;;  %s4890_s9 = sld [smem:[#allocation7_spill]] (!%p3408_p4) }
  0x25   : > { %3629 = vmatmul.mubr.msk.bf16.vlgmr.msra.gmra.mrb[0].mxu0 (!%p3408_p4), %vm843_vm0, %v827_v3 }
  0x29   : > { %v3840_v4 = vld [vmem:[%s4887_s0] sm:$0xff]   ;;  %v3841_v5 = vld [vmem:[%s4887_s0 + $0x8] sm:$0xff]   ;;  %v3842_v6 = vld [vmem:[%s4887_s0 + $0x10] sm:$0xff]  }
  0x2a   : > { %3633 = vmatpush3.bf16.msra.mxu1 %v3840_v4  ;;  %v3843_v7 = vld [vmem:[%s4887_s0 + $0x18] sm:$0xff]   ;;  %v3844_v8 = vld [vmem:[%s4887_s0 + $0x20] sm:$0xff]   ;;  %v3845_v9 = vld [vmem:[%s4887_s0 + $0x28] sm:$0xff]  }
  0x2b   : > { %3634 = vmatprep.subr.bf16.mxu1 %v4110_v1  ;;  %v3846_v10 = vld [vmem:[%s4887_s0 + $0x30] sm:$0xff]   ;;  %v3847_v11 = vld [vmem:[%s4887_s0 + $0x38] sm:$0xff]   ;;  %v3409_v12 = vld [vmem:[%s4888_s6] ss:$0 sm:$0xff] }
  0x2c   : > { %v3413_v29 = vld [vmem:[%s4889_s24] ss:$0 sm:$0xff]  ;;  %v1007_v41 = vld [vmem:[%s4890_s9 + $0x8] sm:$0xff]  ;;  %v1008_v44 = vld [vmem:[%s4890_s9 + $0x10] sm:$0xff] }
  0x2d   : > { %v1006_v40 = vld [vmem:[%s4890_s9] sm:$0xff]  ;;  %v1009_v45 = vld [vmem:[%s4890_s9 + $0x18] sm:$0xff] }
  0x2e   : > { %3635 = vmatpush3.bf16.msra.mxu1 %v3841_v5 }
  0x2f   : > { %3636 = vmatprep.subr.bf16.mxu1 %v4110_v1 }
  0x32   : > { %3637 = vmatpush3.bf16.msra.mxu1 %v3842_v6 }
  0x33   : > { %3638 = vmatprep.subr.bf16.mxu1 %v4110_v1 }
  0x36   : > { %3639 = vmatpush3.bf16.msra.mxu1 %v3843_v7 }
  0x37   : > { %3640 = vmatprep.subr.bf16.mxu1 %v4110_v1 }
  0x3a   : > { %3641 = vmatpush3.bf16.msra.mxu1 %v3844_v8 }
  0x3b   : > { %3642 = vmatprep.subr.bf16.mxu1 %v4110_v1 }
  0x3e   : > { %3643 = vmatpush3.bf16.msra.mxu1 %v3845_v9 }
  0x3f   : > { %3644 = vmatprep.subr.bf16.mxu1 %v4110_v1 }
  0x42   : > { %3645 = vmatpush3.bf16.msra.mxu1 %v3846_v10 }
  0x43   : > { %3646 = vmatprep.subr.bf16.mxu1 %v4110_v1 }
  0x46   : > { %3647 = vmatpush3.bf16.msra.mxu1 %v3847_v11 }
  0xf8   : > { %v881_v13 = vpop.f32.mrb[0].mxu0 }
  0xf9   : > { %v882_v14 = vadd.f32 %v3409_v12, %v881_v13  ;;  %v3630_v15 = vpop.f32.mrb[1].mxu0 }
  0xfa   : > { %v884_v16 = vpop.f32.mrb[2].mxu0 }
  0xfb   : > { %v3412_v17 = vmul.f32 -1.442695, %v882_v14  ;;  %v3631_v18 = vpop.f32.mrb[3].mxu0 }
  0xfd   : > { %3848 = vpow2.f32 %v3412_v17 }
 0x107   : > { %v3849_v19 = vpop.eup %3848 }
 0x108   : > { %v890_v20 = vadd.f32 1.0, %v3849_v19 }
 0x10a   : > { %3850 = vrcp.f32 %v890_v20 }
 0x114   : > { %v3851_v21 = vpop.eup %3850 }
 0x115   : > { %v893_v22 = vmul.f32 %v3851_v21, %v882_v14 }
 0x117   : > { %v894_v23 = vpack.c.bf16 %v893_v22, %v893_v22 }
 0x119   : > { %3649 = vmatmul.mubr.bf16.vlgmr.msra.gmra.mrb[0].mxu1 %v894_v23 }
 0x1ec   : > { %v1000_v31 = vpop.f32.mrb[0].mxu1 }
 0x1ed   : > { %v1001_v32 = vadd.f32 %v3413_v29, %v1000_v31  ;;  %v3650_v33 = vpop.f32.mrb[1].mxu1 }
 0x1ee   : > { %v1003_v34 = vpop.f32.mrb[2].mxu1 }
 0x1ef   : > { %v1017_v35 = vrot.slane %v1001_v32, %v1016_v30  ;;  %v3651_v37 = vpop.f32.mrb[3].mxu1 }
 0x1f1   : > { %v1018_v38 = vcombine.high %v1017_v35, %v1017_v35  ;;  %v1025_v39 = vrot.slane %v1017_v35, %v1016_v30 }
 0x1f3   : > { %v1032_v42 = vrot.slane %v1018_v38, %v1016_v30  ;;  %v1036_v43 = vrot.slane %v1025_v39, %v1035_v36 }
 0x1f5   : > { %v1040_v46 = vrot.slane %v1032_v42, %v1035_v36  ;;  %v1043_v47 = vadd.f32 %v1036_v43, %v1006_v40  ;;  %v1044_v48 = vadd.f32 %v1036_v43, %v1007_v41 }
 0x1f7   : > { %v1045_v49 = vadd.f32 %v1040_v46, %v1008_v44  ;;  %v1046_v50 = vadd.f32 %v1040_v46, %v1009_v45  ;;  %1047 = vst [vmem:[#allocation2] sm:$0xff] %v1043_v47  ;;  %1048 = vst [vmem:[#allocation2 + $0x8] sm:$0xff] %v1044_v48 }
 0x1f9   : > { %1049 = vst [vmem:[#allocation2 + $0x10] sm:$0xff] %v1045_v49  ;;  %1050 = vst [vmem:[#allocation2 + $0x18] sm:$0xff] %v1046_v50 }
 0x1fa PF: > { %v3882_v51 = vld [vmem:[%s4260_s22 + $0x4] ss:$12 sps:$4 sm:$0xff]   ;;  %v3884_v52 = vld [vmem:[%s4260_s22] ss:$12 sps:$4 sm:$0xff]   ;;  %v4113_v53 = vmov 0   ;;  %v4114_v10 = vmov 0.0   ;;  %v1091_v11 = vlaneseq  ;;  %s4891_s27 = scalar_lea.vmem %s4854_s12, %s4247_s26  ;;  %s4892_s2 = scalar_lea.vmem %s4855_s13, %s4247_s26 }
 0x1fb   : > { %1266 = vmatprep.mubr.bf16.mxu0 %v4113_v53  ;;  %1234 = vmatprep.subr.bf16.mxu0 %v3882_v51  ;;  %v3885_v54 = vld [vmem:[%s4260_s22 + $0x1c] ss:$12 sps:$4 sm:$0xff]   ;;  %v3887_v55 = vld [vmem:[%s4260_s22 + $0x18] ss:$12 sps:$4 sm:$0xff]   ;;  %v3888_v56 = vld [vmem:[%s4260_s22 + $0x34] ss:$12 sps:$4 sm:$0xff]   ;;  %s4893_s7 = scalar_lea.vmem %s4856_s14, %s4247_s26 }
 0x1fc   : > { %1235 = vmatpush1.bf16.msra.mxu0 %v3884_v52  ;;  %v3890_v57 = vld [vmem:[%s4260_s22 + $0x30] ss:$12 sps:$4 sm:$0xff]   ;;  %v3891_v58 = vld [vmem:[%s4260_s22 + $0x4c] ss:$12 sps:$4 sm:$0xff]   ;;  %v3893_v60 = vld [vmem:[%s4260_s22 + $0x48] ss:$12 sps:$4 sm:$0xff]  }
 0x1fd   : > { %1236 = vmatprep.subr.bf16.mxu0 %v3885_v54  ;;  %v3894_v62 = vld [vmem:[%s4260_s22 + $0x64] ss:$12 sps:$4 sm:$0xff]   ;;  %v3896_v0 = vld [vmem:[%s4260_s22 + $0x60] ss:$12 sps:$4 sm:$0xff]   ;;  %v3897_v1 = vld [vmem:[%s4260_s22 + $0x7c] ss:$12 sps:$4 sm:$0xff]  }
 0x1fe   : > { %v1051_v59 = vld [vmem:[#allocation2] sm:$0xff]  ;;  %v1052_v61 = vld [vmem:[#allocation2 + $0x8] sm:$0xff]  ;;  %v3902_v4 = vld [vmem:[%s4260_s22 + $0x90] ss:$12 sps:$4 sm:$0xff]   ;;  %vm4115_vm2 = vmmov 0   ;;  %v4382_v12 = vshrl.u32 %v1091_v11, 7 }
 0x1ff   : > { %v1055_v63 = vpack.c.bf16 %v1052_v61, %v1051_v59  ;;  %v3899_v2 = vld [vmem:[%s4260_s22 + $0x78] ss:$12 sps:$4 sm:$0xff]   ;;  %v3900_v3 = vld [vmem:[%s4260_s22 + $0x94] ss:$12 sps:$4 sm:$0xff]   ;;  %vm1342_vm3 = vcmask 261120   ;;  %vm1437_vm4 = vcmask 130048  }
 0x200   : > { %1237 = vmatpush1.bf16.msra.mxu0 %v3887_v55  ;;  %v3903_v5 = vld [vmem:[%s4260_s22 + $0xac] ss:$12 sps:$4 sm:$0xff]   ;;  %v3905_v6 = vld [vmem:[%s4260_s22 + $0xa8] ss:$12 sps:$4 sm:$0xff]   ;;  %v1093_v13 = vsub.s32 0, %v4382_v12  ;;  %v1097_v15 = vsub.s32 1, %v4382_v12 }
 0x201   : > { %1238 = vmatprep.subr.bf16.mxu0 %v3888_v56  ;;  %3668 = vmatprep.mubr.bf16.mxu1 %v1055_v63  ;;  %v1053_v7 = vld [vmem:[#allocation2 + $0x10] sm:$0xff]  ;;  %v1054_v8 = vld [vmem:[#allocation2 + $0x18] sm:$0xff]  ;;  %v4386_v14 = vld [vmem:[%s4269_s8] sm:$0x7]  ;;  %s4116_s8 = smov 96   ;;  %s4118_s24 = smov 32  }
 0x202   : > { %v4375_v9 = vpack.c.bf16 %v1054_v8, %v1053_v7  ;;  %v1094_v16 = vrot.slane %v4386_v14, %v1093_v13  ;;  %v1098_v18 = vrot.slane %v4386_v14, %v1097_v15  ;;  %v3906_v40 = vld [vmem:[%s4260_s22 + $0x8] ss:$12 sps:$4 sm:$0xff]   ;;  %v3907_v41 = vld [vmem:[%s4260_s22 + $0x20] ss:$12 sps:$4 sm:$0xff]   ;;  %v3908_v42 = vld [vmem:[%s4260_s22 + $0x38] ss:$12 sps:$4 sm:$0xff]  }
 0x203   : > { %3652 = vmatprep.subr.bf16.mxu1 %v3906_v40  ;;  %v3909_v43 = vld [vmem:[%s4260_s22 + $0x50] ss:$12 sps:$4 sm:$0xff]   ;;  %v3910_v44 = vld [vmem:[%s4260_s22 + $0x68] ss:$12 sps:$4 sm:$0xff]   ;;  %v3911_v45 = vld [vmem:[%s4260_s22 + $0x80] ss:$12 sps:$4 sm:$0xff]  }
 0x204   : > { %1239 = vmatpush1.bf16.msra.mxu0 %v3890_v57  ;;  %3653 = vmatpush3.bf16.msra.mxu1 %v3906_v40  ;;  %v3912_v46 = vld [vmem:[%s4260_s22 + $0x98] ss:$12 sps:$4 sm:$0xff]   ;;  %v3913_v47 = vld [vmem:[%s4260_s22 + $0xb0] ss:$12 sps:$4 sm:$0xff]   ;;  %s4117_s22 = smov 64   ;;  %vm2356_vm5 = vcmask 523264  }
 0x205   : > { %1240 = vmatprep.subr.bf16.mxu0 %v3891_v58  ;;  %3654 = vmatprep.subr.bf16.mxu1 %v3907_v41  ;;  %vm2361_vm6 = vcmask 785408   ;;  %p3508_p5 = scmp.ne.s32.totalorder %s4241_s25, 3 }
 0x208   : > { %1241 = vmatpush1.bf16.msra.mxu0 %v3893_v60  ;;  %3655 = vmatpush3.bf16.msra.mxu1 %v3907_v41 }
 0x209   : > { %1242 = vmatprep.subr.bf16.mxu0 %v3894_v62  ;;  %3656 = vmatprep.subr.bf16.mxu1 %v3908_v42 }
 0x20c   : > { %1243 = vmatpush1.bf16.msra.mxu0 %v3896_v0  ;;  %3657 = vmatpush3.bf16.msra.mxu1 %v3908_v42 }
 0x20d   : > { %1244 = vmatprep.subr.bf16.mxu0 %v3897_v1  ;;  %3658 = vmatprep.subr.bf16.mxu1 %v3909_v43 }
 0x210   : > { %1245 = vmatpush1.bf16.msra.mxu0 %v3899_v2  ;;  %3659 = vmatpush3.bf16.msra.mxu1 %v3909_v43 }
 0x211   : > { %1246 = vmatprep.subr.bf16.mxu0 %v3900_v3  ;;  %3660 = vmatprep.subr.bf16.mxu1 %v3910_v44 }
 0x214   : > { %1247 = vmatpush1.bf16.msra.mxu0 %v3902_v4  ;;  %3661 = vmatpush3.bf16.msra.mxu1 %v3910_v44 }
 0x215   : > { %1248 = vmatprep.subr.bf16.mxu0 %v3903_v5  ;;  %3662 = vmatprep.subr.bf16.mxu1 %v3911_v45 }
 0x218   : > { %1249 = vmatpush1.bf16.msra.mxu0 %v3905_v6  ;;  %3663 = vmatpush3.bf16.msra.mxu1 %v3911_v45 }
 0x219   : > { %3672 = vmatprep.subr.bf16.mxu0 %v4114_v10  ;;  %3664 = vmatprep.subr.bf16.mxu1 %v3912_v46 }
 0x21b   : > { %1267 = vmatmul.mubr.bf16.vlgmr.msra.gmra.mrb[0].mxu0 %v1055_v63 }
 0x21c   : > { %1276 = vmatprep.mubr.bf16.mxu0 %v4113_v53  ;;  %3665 = vmatpush3.bf16.msra.mxu1 %v3912_v46 }
 0x21d   : > { %3666 = vmatprep.subr.bf16.mxu1 %v3913_v47 }
 0x220   : > { %3667 = vmatpush3.bf16.msra.mxu1 %v3913_v47 }
 0x221   : > { %3684 = vmatprep.subr.bf16.mxu1 %v4114_v10 }
 0x223   : > { %1277 = vmatmul.mubr.bf16.gmra.mrb[4].mxu0 %v4375_v9  ;;  %3669 = vmatmul.mubr.bf16.vlgmr.msra.gmra.mrb[0].mxu1 %v4375_v9 }
 0x224   : > { %3674 = vmatprep.mubr.msk.bf16.mxu0 %vm4115_vm2, %v4114_v10  ;;  %3686 = vmatprep.mubr.msk.bf16.mxu1 %vm4115_vm2, %v4114_v10 }
 0x2ee   : > { %v1268_v17 = vpop.f32.mrb[0].mxu0 }
 0x2ef   : > { %v1270_v19 = vpop.f32.mrb[1].mxu0  ;;  %v1269_v21 = vadd.f32 %v1268_v17, %v1094_v16 }
 0x2f0   : > { %v1272_v20 = vpop.f32.mrb[2].mxu0  ;;  %v1271_v24 = vadd.f32 %v1270_v19, %v1098_v18 }
 0x2f1   : > { %v1273_v22 = vadd.f32 %v1272_v20, %v1094_v16  ;;  %v1274_v23 = vpop.f32.mrb[3].mxu0 }
 0x2f2   : > { %v1275_v25 = vadd.f32 %v1274_v23, %v1098_v18 }
 0x2f3   : > { %v4395_v26 = vpack.c.bf16 %v1273_v22, %v1269_v21 }
 0x2f4   : > { %v4397_v27 = vpack.c.bf16 %v1275_v25, %v1271_v24 }
 0x2f6   : > { %v1278_v28 = vpop.f32.mrb[4].mxu0  ;;  %v1347_v29 = vsel %vm1342_vm3, %v4397_v27, 0  ;;  %v3670_v19 = vpop.f32.mrb[0].mxu1 }
 0x2f7   : > { %v1279_v30 = vadd.f32 %v1278_v28, %v1094_v16  ;;  %v1280_v31 = vpop.f32.mrb[5].mxu0  ;;  %3673 = vmatpush3.bf16.xpose.msra.mxu0 %v1347_v29  ;;  %v1321_v20 = vpop.f32.mrb[1].mxu1 }
 0x2f8   : > { %v1281_v32 = vadd.f32 %v1280_v31, %v1098_v18  ;;  %v1282_v33 = vpop.f32.mrb[6].mxu0  ;;  %3678 = vmatprep.subr.bf16.mxu0 %v4114_v10  ;;  %v3671_v22 = vpop.f32.mrb[2].mxu1 }
 0x2f9   : > { %v1283_v34 = vadd.f32 %v1282_v33, %v1094_v16  ;;  %v1284_v35 = vpop.f32.mrb[7].mxu0  ;;  %v1324_v23 = vpop.f32.mrb[3].mxu1 }
 0x2fa   : > { %v1285_v36 = vadd.f32 %v1284_v35, %v1098_v18  ;;  %v1101_v18 = vsub.s32 2, %v4382_v12 }
 0x2fb   : > { %v4402_v37 = vpack.c.bf16 %v1283_v34, %v1279_v30 }
 0x2fc   : > { %v4404_v38 = vpack.c.bf16 %v1285_v36, %v1281_v32  ;;  %v1102_v21 = vrot.slane %v4386_v14, %v1101_v18 }
 0x2fe   : > { %3675 = vmatmul.mubr.msk.bf16.vlgmr.msra.gmra.mrb[8].mxu0 %vm1342_vm3, %v4395_v26  ;;  %v1394_v39 = vsel %vm1342_vm3, %v4404_v38, 0  ;;  %v1322_v24 = vadd.f32 %v1321_v20, %v1102_v21  ;;  %v1325_v25 = vadd.f32 %v1324_v23, %v1102_v21  ;;  %v1330_v29 = vadd.f32 %v3670_v19, %v1102_v21 }
 0x2ff   : > { %3679 = vmatpush3.bf16.xpose.msra.mxu0 %v1394_v39  ;;  %3680 = vmatprep.mubr.msk.bf16.mxu0 %vm4115_vm2, %v4114_v10  ;;  %v1333_v30 = vadd.f32 %v3671_v22, %v1102_v21 }
 0x300   : > { %3690 = vmatprep.subr.bf16.mxu0 %v4114_v10  ;;  %v4440_v28 = vpack.c.bf16 %v1325_v25, %v1322_v24 }
 0x301   : > { %v4446_v14 = vpack.c.bf16 %v1333_v30, %v1330_v29 }
 0x302   : > { %3685 = vmatpush3.bf16.msra.mxu1 %v4440_v28 }
 0x303   : > { %3696 = vmatprep.subr.bf16.mxu1 %v4114_v10 }
 0x306   : > { %3681 = vmatmul.mubr.msk.bf16.vlgmr.msra.gmra.mrb[12].mxu0 %vm1342_vm3, %v4402_v37 }
 0x307   : > { %3692 = vmatprep.mubr.msk.bf16.mxu0 %vm4115_vm2, %v4114_v10  ;;  %3691 = vmatpush3.bf16.msra.mxu0 %v4446_v14 }
 0x308   : > { %3702 = vmatprep.subr.bf16.mxu0 %v4114_v10 }
 0x3d1   : > { %v1383_v48 = vpop.f32.mrb[8].mxu0 }
 0x3d2   : > { %v3676_v49 = vpop.f32.mrb[9].mxu0  ;;  %v1438_v50 = vsel %vm1437_vm4, %v1383_v48, -inf }
 0x3d3   : > { %1439 = vmax.xlane.f32.xlu0 %v1438_v50  ;;  %v1386_v51 = vpop.f32.mrb[10].mxu0 }
 0x3d4   : > { %v3677_v52 = vpop.f32.mrb[11].mxu0  ;;  %v1441_v54 = vsel %vm1437_vm4, %v1386_v51, -inf }
 0x3d7   : > { %1442 = vmax.xlane.f32.xlu0 %v1441_v54 }
 0x3d9   : > { %v1430_v55 = vpop.f32.mrb[12].mxu0 }
 0x3da   : > { %v1444_v56 = vsel %vm1437_vm4, %v1430_v55, -inf  ;;  %v3682_v57 = vpop.f32.mrb[13].mxu0 }
 0x3db   : > { %1445 = vmax.xlane.f32.xlu1 %v1444_v56  ;;  %v1433_v58 = vpop.f32.mrb[14].mxu0 }
 0x3dc   : > { %v1447_v59 = vsel %vm1437_vm4, %v1433_v58, -inf  ;;  %v3683_v60 = vpop.f32.mrb[15].mxu0 }
 0x3df   : > { %1448 = vmax.xlane.f32.xlu1 %v1447_v59 }
 0x460   : > { %v1440_v61 = vpop.xlane.xlu0 %1439 }
 0x461   : > { %v1450_v62 = vsub.f32 %v1383_v48, %v1440_v61 }
 0x463   : > { %v1454_v63 = vmul.f32 1.442695, %v1450_v62 }
 0x464   : > { %v1443_v0 = vpop.xlane.xlu0 %1442 }
 0x465   : > { %3962 = vpow2.f32 %v1454_v63  ;;  %v1451_v1 = vsub.f32 %v1386_v51, %v1443_v0 }
 0x467   : > { %v1456_v2 = vmul.f32 1.442695, %v1451_v1 }
 0x468   : > { %v1446_v3 = vpop.xlane.xlu1 %1445 }
 0x469   : > { %3964 = vpow2.f32 %v1456_v2  ;;  %v1452_v4 = vsub.f32 %v1430_v55, %v1446_v3 }
 0x46b   : > { %v1458_v5 = vmul.f32 1.442695, %v1452_v4 }
 0x46c   : > { %v1449_v31 = vpop.xlane.xlu1 %1448 }
 0x46d   : > { %3966 = vpow2.f32 %v1458_v5  ;;  %v1453_v32 = vsub.f32 %v1433_v58, %v1449_v31 }
 0x46f   : > { %v3963_v6 = vpop.eup %3962  ;;  %v1460_v33 = vmul.f32 1.442695, %v1453_v32 }
 0x470   : > { %v1462_v7 = vsel %vm1437_vm4, %v3963_v6, 0.0 }
 0x471   : > { %1463 = vadd.xlane.f32.xlu0 %v1462_v7  ;;  %3968 = vpow2.f32 %v1460_v33 }
 0x473   : > { %v3965_v8 = vpop.eup %3964 }
 0x474   : > { %v1465_v9 = vsel %vm1437_vm4, %v3965_v8, 0.0 }
 0x475   : > { %1466 = vadd.xlane.f32.xlu1 %v1465_v9 }
 0x477   : > { %v3967_v16 = vpop.eup %3966 }
 0x478   : > { %v1468_v17 = vsel %vm1437_vm4, %v3967_v16, 0.0 }
 0x479   : > { %1469 = vadd.xlane.f32.xlu0 %v1468_v17 }
 0x47b   : > { %v3969_v34 = vpop.eup %3968 }
 0x47c   : > { %v1471_v35 = vsel %vm1437_vm4, %v3969_v34, 0.0 }
 0x486   : > { %1629 = vrot.lane.b32.xlu1 %v4404_v38, %s4116_s8 }
 0x48f   : > { %1576 = vrot.lane.b32.xlu0 %v4397_v27, %s4116_s8 }
 0x4aa   : > { %1472 = vadd.xlane.f32.xlu1 %v1471_v35 }
 0x4bb   : > { %1573 = vrot.lane.b32.xlu1 %v4395_v26, %s4116_s8 }
 0x4bf   : > { %1626 = vrot.lane.b32.xlu1 %v4402_v37, %s4116_s8 }
 0x4fe   : > { %v1464_v36 = vpop.xlane.xlu0 %1463 }
 0x4ff   : > { %3970 = vrcp.f32 %v1464_v36 }
 0x502   : > { %v1467_v39 = vpop.xlane.xlu1 %1466 }
 0x503   : > { %3972 = vrcp.f32 %v1467_v39 }
 0x506   : > { %v1470_v40 = vpop.xlane.xlu0 %1469  ;;  %v1630_v48 = vpop.permute.xlu1 %1629 }
 0x507   : > { %3974 = vrcp.f32 %v1470_v40  ;;  %v1635_v57 = vsel %vm1342_vm3, %v1630_v48, 0 }
 0x509   : > { %v3971_v41 = vpop.eup %3970 }
 0x50a   : > { %v1478_v43 = vmul.f32 %v3971_v41, %v3963_v6  ;;  %v1577_v45 = vpop.permute.xlu0 %1576 }
 0x50b   : > { %v1582_v47 = vsel %vm1342_vm3, %v1577_v45, 0 }
 0x50d   : > { %v3973_v42 = vpop.eup %3972 }
 0x50e   : > { %v1479_v44 = vmul.f32 %v3973_v42, %v3965_v8 }
 0x510   : > { %v1482_v46 = vpack.c.bf16 %v1479_v44, %v1478_v43 }
 0x511   : > { %v3975_v51 = vpop.eup %3974 }
 0x512   : > { %3687 = vmatmul.mubr.msk.bf16.vlgmr.msra.gmra.mrb[4].mxu1 %vm1437_vm4, %v1482_v46  ;;  %v1480_v54 = vmul.f32 %v3975_v51, %v3967_v16 }
 0x513   : > { %3697 = vmatpush3.bf16.xpose.msra.mxu1 %v1582_v47  ;;  %3698 = vmatprep.mubr.msk.bf16.mxu1 %vm4115_vm2, %v4114_v10 }
 0x514   : > { %3708 = vmatprep.subr.bf16.mxu1 %v4114_v10 }
 0x537   : > { %v1473_v49 = vpop.xlane.xlu1 %1472 }
 0x538   : > { %3976 = vrcp.f32 %v1473_v49 }
 0x53b   : > { %v1574_v50 = vpop.permute.xlu1 %1573 }
 0x53c   : > { %3699 = vmatmul.mubr.msk.bf16.vlgmr.msra.gmra.mrb[8].mxu1 %vm1342_vm3, %v1574_v50 }
 0x53d   : > { %3710 = vmatprep.mubr.msk.bf16.mxu1 %vm4115_vm2, %v4114_v10 }
 0x53f   : > { %v1627_v58 = vpop.permute.xlu1 %1626 }
 0x542   : > { %v3977_v52 = vpop.eup %3976 }
 0x543   : > { %v1481_v55 = vmul.f32 %v3977_v52, %v3969_v34 }
 0x545   : > { %v1483_v56 = vpack.c.bf16 %v1481_v55, %v1480_v54 }
 0x547   : > { %3693 = vmatmul.mubr.msk.bf16.vlgmr.msra.gmra.mrb[16].mxu0 %vm1437_vm4, %v1483_v56 }
 0x548   : > { %3703 = vmatpush3.bf16.xpose.msra.mxu0 %v1635_v57  ;;  %3704 = vmatprep.mubr.msk.bf16.mxu0 %vm4115_vm2, %v4114_v10 }
 0x549   : > { %3714 = vmatprep.subr.bf16.mxu0 %v4114_v10 }
 0x54f   : > { %3705 = vmatmul.mubr.msk.bf16.vlgmr.msra.gmra.mrb[20].mxu0 %vm1342_vm3, %v1627_v58 }
 0x550   : > { %3716 = vmatprep.mubr.msk.bf16.mxu0 %vm4115_vm2, %v4114_v10 }
 0x5e5   : > { %v4471_v59 = vpop.f32.mrb[4].mxu1 }
 0x5e6   : > { %v3688_v60 = vpop.f32.mrb[5].mxu1 }
 0x5e7   : > { %v4473_v61 = vpop.f32.mrb[6].mxu1 }
 0x5e8   : > { %v3689_v62 = vpop.f32.mrb[7].mxu1 }
 0x60f   : > { %v1618_v63 = vpop.f32.mrb[8].mxu1 }
 0x610   : > { %v3700_v0 = vpop.f32.mrb[9].mxu1  ;;  %v1678_v1 = vsel %vm1437_vm4, %v1618_v63, -inf }
 0x611   : > { %1679 = vmax.xlane.f32.xlu0 %v1678_v1  ;;  %v1621_v2 = vpop.f32.mrb[10].mxu1 }
 0x612   : > { %v3701_v3 = vpop.f32.mrb[11].mxu1  ;;  %v1681_v4 = vsel %vm1437_vm4, %v1621_v2, -inf }
 0x613   : > { %1682 = vmax.xlane.f32.xlu1 %v1681_v4 }
 0x61a   : > { %v4477_v5 = vpop.f32.mrb[16].mxu0 }
 0x61b   : > { %v3694_v6 = vpop.f32.mrb[17].mxu0 }
 0x61c   : > { %v4479_v7 = vpop.f32.mrb[18].mxu0 }
 0x61d   : > { %v3695_v8 = vpop.f32.mrb[19].mxu0 }
 0x622   : > { %v1671_v9 = vpop.f32.mrb[20].mxu0 }
 0x623   : > { %v3706_v16 = vpop.f32.mrb[21].mxu0  ;;  %v1684_v17 = vsel %vm1437_vm4, %v1671_v9, -inf }
 0x624   : > { %1685 = vmax.xlane.f32.xlu0 %v1684_v17  ;;  %v1674_v18 = vpop.f32.mrb[22].mxu0 }
 0x625   : > { %v3707_v19 = vpop.f32.mrb[23].mxu0  ;;  %v1687_v20 = vsel %vm1437_vm4, %v1674_v18, -inf }
 0x628   : > { %1688 = vmax.xlane.f32.xlu0 %v1687_v20 }
 0x69e   : > { %v1680_v21 = vpop.xlane.xlu0 %1679 }
 0x69f   : > { %v1690_v22 = vsub.f32 %v1618_v63, %v1680_v21 }
 0x6a0   : > { %v1683_v23 = vpop.xlane.xlu1 %1682 }
 0x6a1   : > { %v1694_v24 = vmul.f32 1.442695, %v1690_v22  ;;  %v1691_v25 = vsub.f32 %v1621_v2, %v1683_v23 }
 0x6a3   : > { %3978 = vpow2.f32 %v1694_v24  ;;  %v1696_v29 = vmul.f32 1.442695, %v1691_v25 }
 0x6a5   : > { %3980 = vpow2.f32 %v1696_v29 }
 0x6ad   : > { %v3979_v30 = vpop.eup %3978 }
 0x6ae   : > { %v1702_v31 = vsel %vm1437_vm4, %v3979_v30, 0.0 }
 0x6af   : > { %v3981_v32 = vpop.eup %3980  ;;  %1703 = vadd.xlane.f32.xlu0 %v1702_v31 }
 0x6b0   : > { %v1705_v33 = vsel %vm1437_vm4, %v3981_v32, 0.0 }
 0x6b1   : > { %1706 = vadd.xlane.f32.xlu1 %v1705_v33  ;;  %v1686_v34 = vpop.xlane.xlu0 %1685 }
 0x6b2   : > { %v1692_v35 = vsub.f32 %v1671_v9, %v1686_v34 }
 0x6b4   : > { %v1698_v36 = vmul.f32 1.442695, %v1692_v35 }
 0x6b5   : > { %v1689_v41 = vpop.xlane.xlu0 %1688 }
 0x6b6   : > { %3982 = vpow2.f32 %v1698_v36  ;;  %v1693_v42 = vsub.f32 %v1674_v18, %v1689_v41 }
 0x6b8   : > { %v1700_v43 = vmul.f32 1.442695, %v1693_v42 }
 0x6ba   : > { %3984 = vpow2.f32 %v1700_v43 }
 0x6c0   : > { %v3983_v39 = vpop.eup %3982 }
 0x6c1   : > { %v1708_v40 = vsel %vm1437_vm4, %v3983_v39, 0.0 }
 0x6c2   : > { %1773 = vrot.lane.b32.xlu1 %v4446_v14, %s4116_s8  ;;  %1709 = vadd.xlane.f32.xlu0 %v1708_v40 }
 0x6c4   : > { %v3985_v44 = vpop.eup %3984 }
 0x6c5   : > { %v1711_v45 = vsel %vm1437_vm4, %v3985_v44, 0.0 }
 0x6c6   : > { %1822 = vrot.lane.b32.xlu1 %v4397_v27, %s4117_s22 }
 0x6d8   : > { %1725 = vrot.lane.b32.xlu0 %v4440_v28, %s4116_s8 }
 0x6dc   : > { %1820 = vrot.lane.b32.xlu0 %v4395_v26, %s4117_s22 }
 0x6ea   : > { %1712 = vadd.xlane.f32.xlu1 %v1711_v45 }
 0x6fb   : > { %1873 = vrot.lane.b32.xlu1 %v4404_v38, %s4117_s22 }
 0x6ff   : > { %1871 = vrot.lane.b32.xlu1 %v4402_v37, %s4117_s22 }
 0x73c   : > { %v1704_v48 = vpop.xlane.xlu0 %1703 }
 0x73e   : > { %v1707_v46 = vpop.xlane.xlu1 %1706 }
 0x73f   : > { %3986 = vrcp.f32 %v1707_v46 }
 0x740   : > { %3988 = vrcp.f32 %v1704_v48 }
 0x742   : > { %v1774_v47 = vpop.permute.xlu1 %1773 }
 0x743   : > { %3715 = vmatpush3.bf16.msra.mxu0 %v1774_v47 }
 0x744   : > { %3726 = vmatprep.subr.bf16.mxu0 %v4114_v10 }
 0x746   : > { %v1823_v57 = vpop.permute.xlu1 %1822 }
 0x747   : > { %v1828_v58 = vsel %vm1342_vm3, %v1823_v57, 0 }
 0x749   : > { %v3987_v49 = vpop.eup %3986 }
 0x74a   : > { %v3989_v51 = vpop.eup %3988  ;;  %v1719_v52 = vmul.f32 %v3987_v49, %v3981_v32 }
 0x74b   : > { %v1718_v54 = vmul.f32 %v3989_v51, %v3979_v30 }
 0x74d   : > { %v1722_v56 = vpack.c.bf16 %v1719_v52, %v1718_v54 }
 0x74f   : > { %v1710_v50 = vpop.xlane.xlu0 %1709 }
 0x750   : > { %3990 = vrcp.f32 %v1710_v50 }
 0x753   : > { %v1726_v55 = vpop.permute.xlu0 %1725 }
 0x754   : > { %3709 = vmatpush3.bf16.msra.mxu1 %v1726_v55 }
 0x755   : > { %3720 = vmatprep.subr.bf16.mxu1 %v4114_v10 }
 0x757   : > { %3711 = vmatmul.mubr.msk.bf16.vlgmr.msra.gmra.mrb[12].mxu1 %vm1437_vm4, %v1722_v56  ;;  %v1821_v60 = vpop.permute.xlu0 %1820 }
 0x758   : > { %3722 = vmatprep.mubr.msk.bf16.mxu1 %vm4115_vm2, %v4114_v10 }
 0x75a   : > { %v3991_v63 = vpop.eup %3990 }
 0x75b   : > { %v1720_v1 = vmul.f32 %v3991_v63, %v3983_v39 }
 0x75d   : > { %3721 = vmatpush3.bf16.xpose.msra.mxu1 %v1828_v58 }
 0x75e   : > { %3732 = vmatprep.subr.bf16.mxu1 %v4114_v10 }
 0x764   : > { %3723 = vmatmul.mubr.msk.bf16.vlgmr.msra.gmra.mrb[16].mxu1 %vm1342_vm3, %v1821_v60 }
 0x765   : > { %3734 = vmatprep.mubr.msk.bf16.mxu1 %vm4115_vm2, %v4114_v10 }
 0x777   : > { %v1713_v62 = vpop.xlane.xlu1 %1712 }
 0x778   : > { %3992 = vrcp.f32 %v1713_v62 }
 0x77b   : > { %v1874_v3 = vpop.permute.xlu1 %1873 }
 0x77c   : > { %v1879_v6 = vsel %vm1342_vm3, %v1874_v3, 0 }
 0x77f   : > { %v1872_v8 = vpop.permute.xlu1 %1871 }
 0x782   : > { %v3993_v0 = vpop.eup %3992 }
 0x783   : > { %v1721_v2 = vmul.f32 %v3993_v0, %v3985_v44 }
 0x785   : > { %v1723_v4 = vpack.c.bf16 %v1721_v2, %v1720_v1 }
 0x787   : > { %3717 = vmatmul.mubr.msk.bf16.vlgmr.msra.gmra.mrb[24].mxu0 %vm1437_vm4, %v1723_v4 }
 0x788   : > { %3727 = vmatpush3.bf16.xpose.msra.mxu0 %v1879_v6  ;;  %3728 = vmatprep.mubr.msk.bf16.mxu0 %vm4115_vm2, %v4114_v10 }
 0x789   : > { %3738 = vmatprep.subr.bf16.mxu0 %v4114_v10 }
 0x78f   : > { %3729 = vmatmul.mubr.msk.bf16.vlgmr.msra.gmra.mrb[28].mxu0 %vm1342_vm3, %v1872_v8 }
 0x790   : > { %3740 = vmatprep.mubr.msk.bf16.mxu0 %vm4115_vm2, %v4114_v10 }
 0x82a   : > { %v4517_v9 = vpop.f32.mrb[12].mxu1 }
 0x82b   : > { %v3712_v16 = vpop.f32.mrb[13].mxu1 }
 0x82c   : > { %v4519_v17 = vpop.f32.mrb[14].mxu1 }
 0x82d   : > { %v3852_v18 = vpack.i.bf16 %v4519_v17, %v4517_v9  ;;  %v3713_v19 = vpop.f32.mrb[15].mxu1 }
 0x837   : > { %v1864_v20 = vpop.f32.mrb[16].mxu1 }
 0x838   : > { %v3724_v21 = vpop.f32.mrb[17].mxu1  ;;  %v1922_v22 = vsel %vm1437_vm4, %v1864_v20, -inf }
 0x839   : > { %1923 = vmax.xlane.f32.xlu0 %v1922_v22  ;;  %v1867_v23 = vpop.f32.mrb[18].mxu1 }
 0x83a   : > { %v3725_v24 = vpop.f32.mrb[19].mxu1  ;;  %v1925_v25 = vsel %vm1437_vm4, %v1867_v23, -inf }
 0x83b   : > { %1926 = vmax.xlane.f32.xlu1 %v1925_v25 }
 0x85a   : > { %v4525_v29 = vpop.f32.mrb[24].mxu0 }
 0x85b   : > { %v3718_v30 = vpop.f32.mrb[25].mxu0 }
 0x85c   : > { %v4527_v31 = vpop.f32.mrb[26].mxu0 }
 0x85d   : > { %v3857_v32 = vpack.i.bf16 %v4527_v31, %v4525_v29  ;;  %v3719_v33 = vpop.f32.mrb[27].mxu0 }
 0x862   : > { %v1915_v34 = vpop.f32.mrb[28].mxu0 }
 0x863   : > { %v3730_v35 = vpop.f32.mrb[29].mxu0  ;;  %v1928_v36 = vsel %vm1437_vm4, %v1915_v34, -inf }
 0x864   : > { %1929 = vmax.xlane.f32.xlu0 %v1928_v36  ;;  %v1918_v39 = vpop.f32.mrb[30].mxu0 }
 0x865   : > { %v3731_v40 = vpop.f32.mrb[31].mxu0  ;;  %v1931_v41 = vsel %vm1437_vm4, %v1918_v39, -inf }
 0x868   : > { %1932 = vmax.xlane.f32.xlu0 %v1931_v41 }
 0x8c6   : > { %v1924_v42 = vpop.xlane.xlu0 %1923 }
 0x8c7   : > { %v1934_v43 = vsub.f32 %v1864_v20, %v1924_v42 }
 0x8c8   : > { %v1927_v44 = vpop.xlane.xlu1 %1926 }
 0x8c9   : > { %v1938_v45 = vmul.f32 1.442695, %v1934_v43  ;;  %v1935_v46 = vsub.f32 %v1867_v23, %v1927_v44 }
 0x8cb   : > { %3994 = vpow2.f32 %v1938_v45  ;;  %v1940_v47 = vmul.f32 1.442695, %v1935_v46 }
 0x8cd   : > { %3996 = vpow2.f32 %v1940_v47 }
 0x8d5   : > { %v3995_v48 = vpop.eup %3994 }
 0x8d6   : > { %v1946_v49 = vsel %vm1437_vm4, %v3995_v48, 0.0 }
 0x8d7   : > { %v3997_v50 = vpop.eup %3996  ;;  %1947 = vadd.xlane.f32.xlu0 %v1946_v49 }
 0x8d8   : > { %v1949_v51 = vsel %vm1437_vm4, %v3997_v50, 0.0 }
 0x8d9   : > { %1950 = vadd.xlane.f32.xlu1 %v1949_v51 }
 0x8ea   : > { %2015 = vrot.lane.b32.xlu1 %v4446_v14, %s4117_s22 }
 0x8ee   : > { %2064 = vrot.lane.b32.xlu1 %v4397_v27, %s4118_s24 }
 0x8f1   : > { %v1930_v52 = vpop.xlane.xlu0 %1929 }
 0x8f2   : > { %v1936_v54 = vsub.f32 %v1915_v34, %v1930_v52 }
 0x8f4   : > { %v1942_v55 = vmul.f32 1.442695, %v1936_v54 }
 0x8f5   : > { %v1933_v56 = vpop.xlane.xlu0 %1932 }
 0x8f6   : > { %3998 = vpow2.f32 %v1942_v55  ;;  %v1937_v57 = vsub.f32 %v1918_v39, %v1933_v56 }
 0x8f8   : > { %v1944_v60 = vmul.f32 1.442695, %v1937_v57 }
 0x8fa   : > { %4000 = vpow2.f32 %v1944_v60 }
 0x900   : > { %v3999_v58 = vpop.eup %3998 }
 0x901   : > { %v1952_v62 = vsel %vm1437_vm4, %v3999_v58, 0.0 }
 0x902   : > { %1953 = vadd.xlane.f32.xlu0 %v1952_v62 }
 0x904   : > { %v4001_v63 = vpop.eup %4000 }
 0x905   : > { %v1955_v0 = vsel %vm1437_vm4, %v4001_v63, 0.0 }
 0x912   : > { %1956 = vadd.xlane.f32.xlu1 %v1955_v0 }
 0x918   : > { %1968 = vrot.lane.b32.xlu0 %v4440_v28, %s4117_s22 }
 0x91c   : > { %2062 = vrot.lane.b32.xlu0 %v4395_v26, %s4118_s24 }
 0x923   : > { %2115 = vrot.lane.b32.xlu1 %v4404_v38, %s4118_s24 }
 0x927   : > { %2113 = vrot.lane.b32.xlu1 %v4402_v37, %s4118_s24 }
 0x964   : > { %v1948_v2 = vpop.xlane.xlu0 %1947 }
 0x966   : > { %v1951_v27 = vpop.xlane.xlu1 %1950 }
 0x967   : > { %4002 = vrcp.f32 %v1951_v27 }
 0x968   : > { %4004 = vrcp.f32 %v1948_v2 }
 0x96a   : > { %v2016_v1 = vpop.permute.xlu1 %2015 }
 0x96b   : > { %3739 = vmatpush3.bf16.msra.mxu0 %v2016_v1 }
 0x96c   : > { %3750 = vmatprep.subr.bf16.mxu0 %v4114_v10 }
 0x96e   : > { %v2065_v37 = vpop.permute.xlu1 %2064 }
 0x96f   : > { %v2070_v38 = vsel %vm1342_vm3, %v2065_v37, 0 }
 0x971   : > { %v4003_v3 = vpop.eup %4002 }
 0x972   : > { %v4005_v6 = vpop.eup %4004  ;;  %v1963_v8 = vmul.f32 %v4003_v3, %v3997_v50 }
 0x973   : > { %v1962_v16 = vmul.f32 %v4005_v6, %v3995_v48 }
 0x975   : > { %v1966_v19 = vpack.c.bf16 %v1963_v8, %v1962_v16 }
 0x98f   : > { %v1954_v4 = vpop.xlane.xlu0 %1953 }
 0x990   : > { %4006 = vrcp.f32 %v1954_v4 }
 0x993   : > { %v1969_v26 = vpop.permute.xlu0 %1968 }
 0x994   : > { %3733 = vmatpush3.bf16.msra.mxu1 %v1969_v26 }
 0x995   : > { %3744 = vmatprep.subr.bf16.mxu1 %v4114_v10 }
 0x997   : > { %3735 = vmatmul.mubr.msk.bf16.vlgmr.msra.gmra.mrb[20].mxu1 %vm1437_vm4, %v1966_v19  ;;  %v2063_v21 = vpop.permute.xlu0 %2062 }
 0x998   : > { %3746 = vmatprep.mubr.msk.bf16.mxu1 %vm4115_vm2, %v4114_v10 }
 0x99a   : > { %v4007_v22 = vpop.eup %4006 }
 0x99b   : > { %v1964_v24 = vmul.f32 %v4007_v22, %v3999_v58 }
 0x99d   : > { %3745 = vmatpush3.bf16.xpose.msra.mxu1 %v2070_v38 }
 0x99e   : > { %3756 = vmatprep.subr.bf16.mxu1 %v4114_v10 }
 0x99f   : > { %v1957_v20 = vpop.xlane.xlu1 %1956 }
 0x9a0   : > { %4008 = vrcp.f32 %v1957_v20 }
 0x9a3   : > { %v2116_v30 = vpop.permute.xlu1 %2115 }
 0x9a4   : > { %3747 = vmatmul.mubr.msk.bf16.vlgmr.msra.gmra.mrb[24].mxu1 %vm1342_vm3, %v2063_v21  ;;  %v2121_v34 = vsel %vm1342_vm3, %v2116_v30, 0 }
 0x9a5   : > { %3758 = vmatprep.mubr.msk.bf16.mxu1 %vm4115_vm2, %v4114_v10 }
 0x9a7   : > { %v2114_v35 = vpop.permute.xlu1 %2113 }
 0x9aa   : > { %v4009_v23 = vpop.eup %4008 }
 0x9ab   : > { %v1965_v25 = vmul.f32 %v4009_v23, %v4001_v63 }
 0x9ad   : > { %v1967_v33 = vpack.c.bf16 %v1965_v25, %v1964_v24 }
 0x9af   : > { %3741 = vmatmul.mubr.msk.bf16.vlgmr.msra.gmra.mrb[32].mxu0 %vm1437_vm4, %v1967_v33 }
 0x9b0   : > { %3751 = vmatpush3.bf16.xpose.msra.mxu0 %v2121_v34  ;;  %3752 = vmatprep.mubr.msk.bf16.mxu0 %vm4115_vm2, %v4114_v10 }
 0x9b1   : > { %3762 = vmatprep.subr.bf16.mxu0 %v4114_v10 }
 0x9b7   : > { %3753 = vmatmul.mubr.msk.bf16.vlgmr.msra.gmra.mrb[36].mxu0 %vm1342_vm3, %v2114_v35 }
 0x9b8   : > { %3764 = vmatprep.mubr.msk.bf16.mxu0 %vm4115_vm2, %v4114_v10 }
 0xa6a   : > { %v2008_v36 = vpop.f32.mrb[20].mxu1 }
 0xa6b   : > { %v3736_v39 = vpop.f32.mrb[21].mxu1 }
 0xa6c   : > { %v2011_v40 = vpop.f32.mrb[22].mxu1 }
 0xa6d   : > { %v3862_v41 = vpack.i.bf16 %v2011_v40, %v2008_v36  ;;  %v3737_v42 = vpop.f32.mrb[23].mxu1 }
 0xa6e   : > { %v3915_v42 = vld [vmem:[%s4255_s4 + $0x8] sm:$0xff]  }
 0xa77   : > { %v2106_v43 = vpop.f32.mrb[24].mxu1 }
 0xa78   : > { %v3748_v44 = vpop.f32.mrb[25].mxu1  ;;  %v2164_v45 = vsel %vm1437_vm4, %v2106_v43, -inf }
 0xa79   : > { %2165 = vmax.xlane.f32.xlu0 %v2164_v45  ;;  %v2109_v46 = vpop.f32.mrb[26].mxu1  ;;  %v3917_v44 = vld [vmem:[%s4255_s4 + $0x18] sm:$0xff]   ;;  %v3918_v45 = vld [vmem:[%s4255_s4 + $0x20] sm:$0xff]  }
 0xa7a   : > { %v3749_v47 = vpop.f32.mrb[27].mxu1  ;;  %v2167_v48 = vsel %vm1437_vm4, %v2109_v46, -inf }
 0xa7b   : > { %2168 = vmax.xlane.f32.xlu1 %v2167_v48  ;;  %v3920_v47 = vld [vmem:[%s4255_s4 + $0x30] sm:$0xff]  }
 0xa82   : > { %v2055_v49 = vpop.f32.mrb[32].mxu0 }
 0xa83   : > { %v3742_v50 = vpop.f32.mrb[33].mxu0 }
 0xa84   : > { %v2058_v51 = vpop.f32.mrb[34].mxu0 }
 0xa85   : > { %v3867_v52 = vpack.i.bf16 %v2058_v51, %v2055_v49  ;;  %v3743_v10 = vpop.f32.mrb[35].mxu0 }
 0xa86   : > { %v3921_v10 = vld [vmem:[%s4255_s4 + $0x38] sm:$0xff]  }
 0xa8a   : > { %v2157_v54 = vpop.f32.mrb[36].mxu0 }
 0xa8b   : > { %v3754_v55 = vpop.f32.mrb[37].mxu0  ;;  %v2170_v56 = vsel %vm1437_vm4, %v2157_v54, -inf }
 0xa8c   : > { %2171 = vmax.xlane.f32.xlu0 %v2170_v56  ;;  %v2160_v57 = vpop.f32.mrb[38].mxu0 }
 0xa8d   : > { %v3755_v58 = vpop.f32.mrb[39].mxu0  ;;  %v2173_v60 = vsel %vm1437_vm4, %v2160_v57, -inf }
 0xa90   : > { %2174 = vmax.xlane.f32.xlu0 %v2173_v60 }
 0xb06   : > { %v2166_v62 = vpop.xlane.xlu0 %2165 }
 0xb07   : > { %v2176_v63 = vsub.f32 %v2106_v43, %v2166_v62  ;;  %v3916_v43 = vld [vmem:[%s4255_s4 + $0x10] sm:$0xff]  }
 0xb08   : > { %v2169_v0 = vpop.xlane.xlu1 %2168 }
 0xb09   : > { %v2180_v27 = vmul.f32 1.442695, %v2176_v63  ;;  %v2177_v1 = vsub.f32 %v2109_v46, %v2169_v0  ;;  %v3919_v46 = vld [vmem:[%s4255_s4 + $0x28] sm:$0xff]  }
 0xb0b   : > { %4010 = vpow2.f32 %v2180_v27  ;;  %v2182_v2 = vmul.f32 1.442695, %v2177_v1 }
 0xb0d   : > { %4012 = vpow2.f32 %v2182_v2 }
 0xb15   : > { %v4011_v3 = vpop.eup %4010 }
 0xb16   : > { %v2188_v4 = vsel %vm1437_vm4, %v4011_v3, 0.0 }
 0xb17   : > { %v4013_v6 = vpop.eup %4012  ;;  %2189 = vadd.xlane.f32.xlu0 %v2188_v4 }
 0xb18   : > { %v2191_v8 = vsel %vm1437_vm4, %v4013_v6, 0.0 }
 0xb19   : > { %2192 = vadd.xlane.f32.xlu1 %v2191_v8  ;;  %v2172_v16 = vpop.xlane.xlu0 %2171 }
 0xb1a   : > { %v2178_v26 = vsub.f32 %v2157_v54, %v2172_v16 }
 0xb1c   : > { %v2184_v19 = vmul.f32 1.442695, %v2178_v26 }
 0xb1d   : > { %v2175_v37 = vpop.xlane.xlu0 %2174 }
 0xb1e   : > { %4014 = vpow2.f32 %v2184_v19  ;;  %v2179_v38 = vsub.f32 %v2160_v57, %v2175_v37 }
 0xb20   : > { %v2186_v20 = vmul.f32 1.442695, %v2179_v38 }
 0xb22   : > { %4016 = vpow2.f32 %v2186_v20 }
 0xb28   : > { %v4015_v21 = vpop.eup %4014 }
 0xb29   : > { %v2194_v22 = vsel %vm1437_vm4, %v4015_v21, 0.0 }
 0xb2a   : > { %2195 = vadd.xlane.f32.xlu0 %v2194_v22 }
 0xb2c   : > { %v4017_v23 = vpop.eup %4016 }
 0xb2d   : > { %v2197_v24 = vsel %vm1437_vm4, %v4017_v23, 0.0 }
 0xb2e   : > { %2198 = vadd.xlane.f32.xlu1 %v2197_v24 }
 0xb3f   : > { %2257 = vrot.lane.b32.xlu1 %v4446_v14, %s4118_s24 }
 0xb40   : > { %2210 = vrot.lane.b32.xlu0 %v4440_v28, %s4118_s24 }
 0xb43   : > { %3853 = vrot.lane.b32.xlu1 %v3852_v18, %s4118_s24 }
 0xb44   : > { %3863 = vrot.lane.b32.xlu0 %v3862_v41, %s4117_s22  ;;  %v3914_v41 = vld [vmem:[%s4255_s4] sm:$0xff]   ;;  %s4895_s4 = sld [smem:[#allocation14_spill]] (!%p3508_p5) }
 0xb47   : > { %3858 = vrot.lane.b32.xlu1 %v3857_v32, %s4118_s24  ;;  %s4894_s24 = scalar_lea.vmem %s4858_s16, %s4247_s26 }
 0xb4b   : > { %3868 = vrot.lane.b32.xlu1 %v3867_v52, %s4117_s22 }
 0xba4   : > { %v2190_v30 = vpop.xlane.xlu0 %2189 }
 0xba6   : > { %v2193_v25 = vpop.xlane.xlu1 %2192 }
 0xba7   : > { %4018 = vrcp.f32 %v2193_v25 }
 0xba8   : > { %4020 = vrcp.f32 %v2190_v30 }
 0xbb1   : > { %v4019_v14 = vpop.eup %4018 }
 0xbb2   : > { %v4021_v33 = vpop.eup %4020  ;;  %v2205_v34 = vmul.f32 %v4019_v14, %v4013_v6 }
 0xbb3   : > { %v2204_v9 = vmul.f32 %v4021_v33, %v4011_v3 }
 0xbb5   : > { %v2208_v29 = vpack.c.bf16 %v2205_v34, %v2204_v9 }
 0xbb7   : > { %v2196_v28 = vpop.xlane.xlu0 %2195 }
 0xbb8   : > { %4022 = vrcp.f32 %v2196_v28 }
 0xbbb   : > { %v2199_v17 = vpop.xlane.xlu1 %2198  ;;  %v2211_v18 = vpop.permute.xlu0 %2210 }
 0xbbc   : > { %4024 = vrcp.f32 %v2199_v17  ;;  %3757 = vmatpush3.bf16.msra.mxu1 %v2211_v18 }
 0xbbd   : > { %3768 = vmatprep.subr.bf16.mxu1 %v3914_v41 }
 0xbbf   : > { %v2258_v31 = vpop.permute.xlu1 %2257  ;;  %3759 = vmatmul.mubr.msk.bf16.vlgmr.msra.gmra.mrb[28].mxu1 %vm1437_vm4, %v2208_v29  ;;  %v3864_v0 = vpop.permute.xlu0 %3863 }
 0xbc0   : > { %3763 = vmatpush3.bf16.msra.mxu0 %v2258_v31  ;;  %3769 = vmatpush3.bf16.msra.mxu1 %v3914_v41  ;;  %v3866_v2 = vunpack.i.h.bf16 %v3864_v0  ;;  %v3865_v3 = vunpack.i.l.bf16 %v3864_v0 }
 0xbc1   : > { %3770 = vmatprep.subr.bf16.mxu1 %v3915_v42 }
 0xbc2   : > { %v4023_v32 = vpop.eup %4022 }
 0xbc3   : > { %v2206_v36 = vmul.f32 %v4023_v32, %v4015_v21  ;;  %v3854_v60 = vpop.permute.xlu1 %3853 }
 0xbc4   : > { %3771 = vmatpush3.bf16.msra.mxu1 %v3915_v42  ;;  %v3856_v62 = vunpack.i.h.bf16 %v3854_v60  ;;  %v3855_v63 = vunpack.i.l.bf16 %v3854_v60  ;;  %v4043_v42 = vld [vmem:[#allocation2 + $0x8] sm:$0xff] }
 0xbc5   : > { %3772 = vmatprep.subr.bf16.mxu1 %v3916_v43 }
 0xbc6   : > { %v4025_v35 = vpop.eup %4024  ;;  %v2353_v27 = vsel %vm1342_vm3, %v4473_v61, %v3856_v62  ;;  %v2352_v1 = vsel %vm1342_vm3, %v4471_v59, %v3855_v63 }
 0xbc7   : > { %v2207_v39 = vmul.f32 %v4025_v35, %v4017_v23  ;;  %v3859_v6 = vpop.permute.xlu1 %3858  ;;  %v2357_v26 = vsel %vm2356_vm5, %v2352_v1, %v3865_v3  ;;  %v2358_v19 = vsel %vm2356_vm5, %v2353_v27, %v3866_v2 }
 0xbc8   : > { %3773 = vmatpush3.bf16.msra.mxu1 %v3916_v43  ;;  %v3861_v59 = vunpack.i.h.bf16 %v3859_v6  ;;  %v3860_v21 = vunpack.i.l.bf16 %v3859_v6 }
 0xbc9   : > { %v2209_v40 = vpack.c.bf16 %v2207_v39, %v2206_v36  ;;  %3774 = vmatprep.subr.bf16.mxu1 %v3917_v44 }
 0xbca   : > { %v2355_v25 = vsel %vm1342_vm3, %v4479_v7, %v3861_v59  ;;  %v2354_v30 = vsel %vm1342_vm3, %v4477_v5, %v3860_v21  ;;  %v3462_v7 = vld [vmem:[%s4891_s27] ss:$0 sm:$0xff]  ;;  %v3942_v59 = vld [vmem:[%s4291_s28 + $0x64] ss:$8 sps:$4 sm:$0xff]  }
 0xbcb   : > { %3765 = vmatmul.mubr.msk.bf16.vlgmr.msra.gmra.mrb[40].mxu0 %vm1437_vm4, %v2209_v40  ;;  %v3869_v20 = vpop.permute.xlu1 %3868  ;;  %v4042_v40 = vld [vmem:[#allocation2] sm:$0xff] }
 0xbcc   : > { %2701 = vmatprep.mubr.bf16.mxu0 %v4113_v53  ;;  %3775 = vmatpush3.bf16.msra.mxu1 %v3917_v44  ;;  %v3871_v22 = vunpack.i.h.bf16 %v3869_v20  ;;  %v3870_v23 = vunpack.i.l.bf16 %v3869_v20  ;;  %v3937_v20 = vld [vmem:[%s4291_s28 + $0x50] ss:$8 sps:$4 sm:$0xff]   ;;  %v3940_v21 = vld [vmem:[%s4291_s28 + $0x60] ss:$8 sps:$4 sm:$0xff]  }
 0xbcd   : > { %3776 = vmatprep.subr.bf16.mxu1 %v3918_v45 }
 0xbce   : > { %v2359_v33 = vsel %vm2356_vm5, %v2354_v30, %v3870_v23  ;;  %v2360_v34 = vsel %vm2356_vm5, %v2355_v25, %v3871_v22  ;;  %v3945_v22 = vld [vmem:[%s4291_s28 + $0x74] ss:$8 sps:$4 sm:$0xff]   ;;  %v3943_v23 = vld [vmem:[%s4291_s28 + $0x70] ss:$8 sps:$4 sm:$0xff]   ;;  %v3947_v25 = vld [vmem:[%s4302_s30] sm:$0xff]  }
 0xbcf   : > { %v3948_v30 = vld [vmem:[%s4302_s30 + $0x48] sm:$0xff]  }
 0xbd0   : > { %3777 = vmatpush3.bf16.msra.mxu1 %v3918_v45  ;;  %v4044_v45 = vld [vmem:[#allocation2 + $0x10] sm:$0xff] }
 0xbd1   : > { %3778 = vmatprep.subr.bf16.mxu1 %v3919_v46 }
 0xbd4   : > { %3779 = vmatpush3.bf16.msra.mxu1 %v3919_v46 }
 0xbd5   : > { %3780 = vmatprep.subr.bf16.mxu1 %v3920_v47 }
 0xbd8   : > { %3781 = vmatpush3.bf16.msra.mxu1 %v3920_v47  ;;  %v4045_v47 = vld [vmem:[#allocation2 + $0x18] sm:$0xff] }
 0xbd9   : > { %3782 = vmatprep.subr.bf16.mxu1 %v3921_v10 }
 0xbdc   : > { %3783 = vmatpush3.bf16.msra.mxu1 %v3921_v10 }
 0xc92   : > { %v2250_v48 = vpop.f32.mrb[28].mxu1 }
 0xc93   : > { %v3760_v49 = vpop.f32.mrb[29].mxu1 }
 0xc94   : > { %v2253_v50 = vpop.f32.mrb[30].mxu1  ;;  %v3922_v49 = vld [vmem:[%s4291_s28] ss:$8 sps:$4 sm:$0xff]  }
 0xc95   : > { %v3872_v51 = vpack.i.bf16 %v2253_v50, %v2250_v48  ;;  %v3761_v52 = vpop.f32.mrb[31].mxu1  ;;  %v3924_v50 = vld [vmem:[%s4291_s28 + $0x4] ss:$8 sps:$4 sm:$0xff]  }
 0xc96   : > { %2669 = vmatprep.subr.bf16.mxu0 %v3924_v50  ;;  %v3925_v52 = vld [vmem:[%s4291_s28 + $0x10] ss:$8 sps:$4 sm:$0xff]  }
 0xc97   : > { %3873 = vrot.lane.b32.xlu0 %v3872_v51, %s4116_s8  ;;  %v3927_v51 = vld [vmem:[%s4291_s28 + $0x14] ss:$8 sps:$4 sm:$0xff]   ;;  %2670 = vmatpush1.bf16.msra.mxu0 %v3922_v49 }
 0xc98   : > { %2671 = vmatprep.subr.bf16.mxu0 %v3927_v51 }
 0xc9b   : > { %2672 = vmatpush1.bf16.msra.mxu0 %v3925_v52  ;;  %v3472_v52 = vld [vmem:[%s4893_s7] ss:$0 sm:$0xff] }
 0xc9e   : > { %v2297_v54 = vpop.f32.mrb[40].mxu0 }
 0xc9f   : > { %v3766_v55 = vpop.f32.mrb[41].mxu0 }
 0xca0   : > { %v2300_v56 = vpop.f32.mrb[42].mxu0 }
 0xca1   : > { %v3877_v57 = vpack.i.bf16 %v2300_v56, %v2297_v54  ;;  %v3767_v58 = vpop.f32.mrb[43].mxu0 }
 0xca3   : > { %3878 = vrot.lane.b32.xlu1 %v3877_v57, %s4116_s8 }
 0xd09   : > { %v3874_v4 = vpop.permute.xlu0 %3873 }
 0xd0a   : > { %v3876_v8 = vunpack.i.h.bf16 %v3874_v4  ;;  %v3875_v16 = vunpack.i.l.bf16 %v3874_v4 }
 0xd0c   : > { %v2362_v37 = vsel %vm2361_vm6, %v2357_v26, %v3875_v16  ;;  %v2363_v38 = vsel %vm2361_vm6, %v2358_v19, %v3876_v8  ;;  %v3930_v8 = vld [vmem:[%s4291_s28 + $0x24] ss:$8 sps:$4 sm:$0xff]   ;;  %v3928_v16 = vld [vmem:[%s4291_s28 + $0x20] ss:$8 sps:$4 sm:$0xff]   ;;  %v3933_v26 = vld [vmem:[%s4291_s28 + $0x34] ss:$8 sps:$4 sm:$0xff]  }
 0xd0d   : > { %v2366_v61 = vpack.c.bf16 %v2363_v38, %v2362_v37  ;;  %2673 = vmatprep.subr.bf16.mxu0 %v3930_v8  ;;  %v3931_v19 = vld [vmem:[%s4291_s28 + $0x30] ss:$8 sps:$4 sm:$0xff]   ;;  %v3936_v37 = vld [vmem:[%s4291_s28 + $0x44] ss:$8 sps:$4 sm:$0xff]   ;;  %v3934_v38 = vld [vmem:[%s4291_s28 + $0x40] ss:$8 sps:$4 sm:$0xff]  }
 0xd0e   : > { %2674 = vmatpush1.bf16.msra.mxu0 %v3928_v16  ;;  %v3961_v8 = vld [vmem:[%s4302_s30 + $0x38] sm:$0xff]   ;;  %v2577_v16 = vld [vmem:[%s4297_s3] sm:$0x3] }
 0xd0f   : > { %3784 = vmatprep.mubr.bf16.mxu1 %v2366_v61  ;;  %2675 = vmatprep.subr.bf16.mxu0 %v3933_v26  ;;  %v3939_v61 = vld [vmem:[%s4291_s28 + $0x54] ss:$8 sps:$4 sm:$0xff]   ;;  %v2586_v26 = vrot.slane %v2577_v16, %v1097_v15  ;;  %s4897_s28 = sld [smem:[#allocation9_spill]] (!%p3508_p5) }
 0xd12   : > { %2676 = vmatpush1.bf16.msra.mxu0 %v3931_v19 }
 0xd13   : > { %2677 = vmatprep.subr.bf16.mxu0 %v3936_v37 }
 0xd15   : > { %v3879_v24 = vpop.permute.xlu1 %3878 }
 0xd16   : > { %v3881_v14 = vunpack.i.h.bf16 %v3879_v24  ;;  %v3880_v28 = vunpack.i.l.bf16 %v3879_v24  ;;  %2678 = vmatpush1.bf16.msra.mxu0 %v3934_v38  ;;  %v3946_v24 = vld [vmem:[%s4302_s30 + $0x40] sm:$0xff]  }
 0xd17   : > { %2679 = vmatprep.subr.bf16.mxu0 %v3939_v61  ;;  %3588 = vmatprep.subr.bf16.mxu1 %v3946_v24 }
 0xd18   : > { %v2365_v9 = vsel %vm2361_vm6, %v2360_v34, %v3881_v14  ;;  %v2364_v17 = vsel %vm2361_vm6, %v2359_v33, %v3880_v28  ;;  %v3949_v14 = vld [vmem:[%s4302_s30 + $0x8] sm:$0xff]   ;;  %v3950_v28 = vld [vmem:[%s4302_s30 + $0x50] sm:$0xff]   ;;  %v3952_v34 = vld [vmem:[%s4302_s30 + $0x58] sm:$0xff]  }
 0xd19   : > { %v2367_v18 = vpack.c.bf16 %v2365_v9, %v2364_v17  ;;  %v3951_v33 = vld [vmem:[%s4302_s30 + $0x10] sm:$0xff]   ;;  %v3953_v9 = vld [vmem:[%s4302_s30 + $0x18] sm:$0xff]   ;;  %v3954_v17 = vld [vmem:[%s4302_s30 + $0x60] sm:$0xff]  }
 0xd1a   : > { %2680 = vmatpush1.bf16.msra.mxu0 %v3937_v20 }
 0xd1b   : > { %3785 = vmatmul.mubr.bf16.vlgmr.msra.gmra.mrb[32].mxu1 %v2367_v18  ;;  %2681 = vmatprep.subr.bf16.mxu0 %v3942_v59  ;;  %v3955_v18 = vld [vmem:[%s4302_s30 + $0x20] sm:$0xff]  }
 0xd1c   : > { %3589 = vmatpush3.bf16.msra.mxu1 %v3947_v25 }
 0xd1d   : > { %3590 = vmatprep.subr.bf16.mxu1 %v3948_v30 }
 0xd1e   : > { %2682 = vmatpush1.bf16.msra.mxu0 %v3940_v21 }
 0xd1f   : > { %2683 = vmatprep.subr.bf16.mxu0 %v3945_v22 }
 0xd20   : > { %3591 = vmatpush3.bf16.msra.mxu1 %v3949_v14 }
 0xd21   : > { %3592 = vmatprep.subr.bf16.mxu1 %v3950_v28 }
 0xd22   : > { %2684 = vmatpush1.bf16.msra.mxu0 %v3943_v23 }
 0xd24   : > { %3593 = vmatpush3.bf16.msra.mxu1 %v3951_v33 }
 0xd25   : > { %3594 = vmatprep.subr.bf16.mxu1 %v3952_v34 }
 0xd28   : > { %3595 = vmatpush3.bf16.msra.mxu1 %v3953_v9 }
 0xd29   : > { %3596 = vmatprep.subr.bf16.mxu1 %v3954_v17 }
 0xd2c   : > { %3597 = vmatpush3.bf16.msra.mxu1 %v3955_v18 }
 0xdee   : > { %v3786_v29 = vpop.f32.mrb[32].mxu1 }
 0xdef   : > { %v2473_v31 = vpop.f32.mrb[33].mxu1  ;;  %v2482_v36 = vadd.f32 %v3786_v29, %v3462_v7 }
 0xdf0   : > { %v2474_v5 = vadd.f32 %v3462_v7, %v2473_v31  ;;  %v3787_v32 = vpop.f32.mrb[34].mxu1 }
 0xdf1   : > { %v2476_v35 = vpop.f32.mrb[35].mxu1  ;;  %v2485_v44 = vadd.f32 %v3787_v32, %v3462_v7  ;;  %v2490_v46 = vadd.f32 %v4044_v45, %v2482_v36 }
 0xdf2   : > { %v2477_v39 = vadd.f32 %v3462_v7, %v2476_v35  ;;  %v2488_v41 = vadd.f32 %v4042_v40, %v2474_v5  ;;  %v3956_v7 = vld [vmem:[%s4302_s30 + $0x68] sm:$0xff]  }
 0xdf3   : > { %v2491_v48 = vadd.f32 %v4045_v47, %v2485_v44  ;;  %3598 = vmatprep.subr.bf16.mxu1 %v3956_v7 }
 0xdf4   : > { %2494 = vadd.xlane.f32.xlu0 %v2488_v41  ;;  %v2489_v43 = vadd.f32 %v4043_v42, %v2477_v39 }
 0xdf6   : > { %2496 = vadd.xlane.f32.xlu1 %v2489_v43 }
 0xdf8   : > { %2498 = vadd.xlane.f32.xlu0 %v2490_v46 }
 0xdfc   : > { %2500 = vadd.xlane.f32.xlu0 %v2491_v48 }
 0xe81   : > { %v2495_v10 = vpop.xlane.xlu0 %2494 }
 0xe82   : > { %v2503_v54 = vmul.f32 0.0078125, %v2495_v10 }
 0xe83   : > { %v2497_v55 = vpop.xlane.xlu1 %2496 }
 0xe84   : > { %v4627_v56 = vsub.f32 %v2488_v41, %v2503_v54  ;;  %v2504_v57 = vmul.f32 0.0078125, %v2497_v55 }
 0xe85   : > { %v2499_v58 = vpop.xlane.xlu0 %2498 }
 0xe86   : > { %v4629_v60 = vsub.f32 %v2489_v43, %v2504_v57  ;;  %v2505_v62 = vmul.f32 0.0078125, %v2499_v58  ;;  %v2511_v63 = vmul.f32 %v4627_v56, %v4627_v56 }
 0xe88   : > { %v4633_v0 = vsub.f32 %v2490_v46, %v2505_v62  ;;  %2515 = vadd.xlane.f32.xlu0 %v2511_v63  ;;  %v2512_v27 = vmul.f32 %v4629_v60, %v4629_v60  ;;  %v3471_v46 = vld [vmem:[%s4892_s2] ss:$0 sm:$0xff] }
 0xe89   : > { %v2501_v1 = vpop.xlane.xlu0 %2500 }
 0xe8a   : > { %v2506_v2 = vmul.f32 0.0078125, %v2501_v1  ;;  %2517 = vadd.xlane.f32.xlu1 %v2512_v27  ;;  %v2513_v3 = vmul.f32 %v4633_v0, %v4633_v0 }
 0xe8c   : > { %v4639_v4 = vsub.f32 %v2491_v48, %v2506_v2  ;;  %2519 = vadd.xlane.f32.xlu0 %v2513_v3  ;;  %v3957_v2 = vld [vmem:[%s4302_s30 + $0x28] sm:$0xff]   ;;  %v3958_v3 = vld [vmem:[%s4302_s30 + $0x70] sm:$0xff]  }
 0xe8d   : > { %3599 = vmatpush3.bf16.msra.mxu1 %v3957_v2 }
 0xe8e   : > { %v2514_v6 = vmul.f32 %v4639_v4, %v4639_v4  ;;  %3600 = vmatprep.subr.bf16.mxu1 %v3958_v3 }
 0xe90   : > { %2521 = vadd.xlane.f32.xlu1 %v2514_v6  ;;  %v3959_v6 = vld [vmem:[%s4302_s30 + $0x30] sm:$0xff]  }
 0xe91   : > { %3601 = vmatpush3.bf16.msra.mxu1 %v3959_v6 }
 0xf15   : > { %v2516_v29 = vpop.xlane.xlu0 %2515 }
 0xf16   : > { %v2523_v31 = vmul.f32 0.0078125, %v2516_v29 }
 0xf17   : > { %v2518_v5 = vpop.xlane.xlu1 %2517 }
 0xf18   : > { %v2527_v32 = vadd.f32 1e-05, %v2523_v31  ;;  %v2524_v35 = vmul.f32 0.0078125, %v2518_v5 }
 0xf19   : > { %v2520_v36 = vpop.xlane.xlu0 %2519 }
 0xf1a   : > { %4026 = vrsqrt.f32 %v2527_v32  ;;  %v2528_v39 = vadd.f32 1e-05, %v2524_v35  ;;  %v2525_v40 = vmul.f32 0.0078125, %v2520_v36 }
 0xf1c   : > { %4028 = vrsqrt.f32 %v2528_v39  ;;  %v2529_v41 = vadd.f32 1e-05, %v2525_v40  ;;  %v3489_v39 = vld [vmem:[%s820_s23] ss:$0 sm:$0xff] }
 0xf1d   : > { %v2522_v42 = vpop.xlane.xlu1 %2521 }
 0xf1e   : > { %4030 = vrsqrt.f32 %v2529_v41  ;;  %v2526_v43 = vmul.f32 0.0078125, %v2522_v42 }
 0xf20   : > { %v2530_v44 = vadd.f32 1e-05, %v2526_v43 }
 0xf22   : > { %4032 = vrsqrt.f32 %v2530_v44 }
 0xf24   : > { %v4027_v45 = vpop.eup %4026 }
 0xf25   : > { %v2535_v47 = vmul.f32 %v4027_v45, %v4627_v56 }
 0xf26   : > { %v4029_v48 = vpop.eup %4028 }
 0xf27   : > { %v2536_v49 = vmul.f32 %v4029_v48, %v4629_v60  ;;  %v2545_v50 = vmul.f32 %v3471_v46, %v2535_v47 }
 0xf28   : > { %v4031_v51 = vpop.eup %4030 }
 0xf29   : > { %v2546_v10 = vmul.f32 %v3471_v46, %v2536_v49  ;;  %v4678_v54 = vadd.f32 %v3472_v52, %v2545_v50  ;;  %v2537_v56 = vmul.f32 %v4031_v51, %v4633_v0 }
 0xf2b   : > { %v4680_v55 = vadd.f32 %v3472_v52, %v2546_v10  ;;  %v2547_v62 = vmul.f32 %v3471_v46, %v2537_v56 }
 0xf2c   : > { %v4033_v57 = vpop.eup %4032 }
 0xf2d   : > { %v2559_v58 = vpack.c.bf16 %v4680_v55, %v4678_v54  ;;  %v2538_v60 = vmul.f32 %v4033_v57, %v4639_v4  ;;  %v4689_v1 = vadd.f32 %v3472_v52, %v2547_v62  ;;  %v3960_v4 = vld [vmem:[%s4302_s30 + $0x78] sm:$0xff]  }
 0xf2e   : > { %3602 = vmatprep.subr.bf16.mxu1 %v3960_v4 }
 0xf2f   : > { %2702 = vmatmul.mubr.bf16.vlgmr.msra.gmra.mrb[44].mxu0 %v2559_v58  ;;  %v2548_v63 = vmul.f32 %v3471_v46, %v2538_v60  ;;  %3603 = vmatpush3.bf16.msra.mxu1 %v3961_v8 }
 0xf30   : > { %2711 = vmatprep.mubr.bf16.mxu0 %v4113_v53  ;;  %v2582_v53 = vrot.slane %v2577_v16, %v1093_v13 }
 0xf31   : > { %v4687_v27 = vadd.f32 %v3472_v52, %v2548_v63 }
 0xf33   : > { %v2560_v0 = vpack.c.bf16 %v4687_v27, %v4689_v1 }
 0xf37   : > { %2712 = vmatmul.mubr.bf16.gmra.mrb[48].mxu0 %v2560_v0 }
0x1002   : > { %v2703_v19 = vpop.f32.mrb[44].mxu0 }
0x1003   : > { %v2704_v37 = vadd.f32 %v2703_v19, %v2582_v53  ;;  %v2705_v38 = vpop.f32.mrb[45].mxu0 }
0x1004   : > { %v2706_v61 = vadd.f32 %v2705_v38, %v2586_v26  ;;  %v2707_v20 = vpop.f32.mrb[46].mxu0 }
0x1005   : > { %v2708_v59 = vadd.f32 %v2707_v20, %v2582_v53  ;;  %v2709_v21 = vpop.f32.mrb[47].mxu0  ;;  %v2722_v23 = vmax.f32 %v2704_v37, 0.0 }
0x1006   : > { %v2710_v22 = vadd.f32 %v2709_v21, %v2586_v26  ;;  %v2723_v25 = vmax.f32 %v2706_v61, 0.0 }
0x1007   : > { %v2724_v24 = vmax.f32 %v2708_v59, 0.0 }
0x1008   : > { %v2725_v30 = vmax.f32 %v2710_v22, 0.0 }
0x1009   : > { %v2730_v14 = vpack.c.bf16 %v2724_v24, %v2722_v23 }
0x100a   : > { %v2731_v28 = vpack.c.bf16 %v2725_v30, %v2723_v25  ;;  %v2713_v33 = vpop.f32.mrb[48].mxu0 }
0x100b   : > { %v2714_v34 = vadd.f32 %v2713_v33, %v2582_v53  ;;  %v2715_v13 = vpop.f32.mrb[49].mxu0 }
0x100c   : > { %v2716_v9 = vadd.f32 %v2715_v13, %v2586_v26  ;;  %v2717_v12 = vpop.f32.mrb[50].mxu0  ;;  %2901 = vmatprep.mubr.bf16.mxu1 %v2731_v28 }
0x100d   : > { %v2718_v15 = vadd.f32 %v2717_v12, %v2582_v53  ;;  %v2719_v17 = vpop.f32.mrb[51].mxu0  ;;  %2902 = vmatmul.mubr.bf16.vlgmr.msra.gmra.mrb[36].mxu1 %v2730_v14  ;;  %v2726_v7 = vmax.f32 %v2714_v34, 0.0  ;;  %v3506_v34 = vld [vmem:[%s800_s5] ss:$0 sm:$0xff]  ;;  %s4896_s5 = sld [smem:[#allocation15_spill]] (!%p3508_p5) }
0x100e   : > { %v2720_v18 = vadd.f32 %v2719_v17, %v2586_v26  ;;  %v2727_v31 = vmax.f32 %v2716_v9, 0.0  ;;  %v3507_v12 = vld [vmem:[%s4894_s24] ss:$0 sm:$0xff] }
0x100f   : > { %v2728_v29 = vmax.f32 %v2718_v15, 0.0 }
0x1010   : > { %v2729_v5 = vmax.f32 %v2720_v18, 0.0 }
0x1011   : > { %v2732_v32 = vpack.c.bf16 %v2728_v29, %v2726_v7 }
0x1012   : > { %v2733_v35 = vpack.c.bf16 %v2729_v5, %v2727_v31 }
0x1014   : > { %2909 = vmatprep.mubr.bf16.mxu1 %v2733_v35 }
0x1015   : > { %2910 = vmatmul.mubr.bf16.gmra.mrb[40].mxu1 %v2732_v32 }
0x10e0   : > { %v3604_v36 = vpop.f32.mrb[36].mxu1 }
0x10e1   : > { %v3605_v40 = vpop.f32.mrb[37].mxu1 }
0x10e2   : > { %v3606_v41 = vadd.f32 %v3605_v40, %v3604_v36  ;;  %v3607_v42 = vpop.f32.mrb[38].mxu1 }
0x10e3   : > { %v3608_v43 = vpop.f32.mrb[39].mxu1 }
0x10e4   : > { %v2904_v44 = vadd.f32 %v3606_v41, %v3489_v39  ;;  %v3609_v45 = vadd.f32 %v3608_v43, %v3607_v42  ;;  %v4048_v42 = vld [vmem:[%s4895_s4] sm:$0xff] (!%p3508_p5)  }
0x10e5   : > { %3788 = vmatprep.subr.bf16.mxu0 (!%p3508_p5), %v4048_v42 }
0x10e6   : > { %v2907_v46 = vadd.f32 %v3609_v45, %v3489_v39  ;;  %v2918_v47 = vadd.f32 %v2904_v44, %v4678_v54  ;;  %v4049_v44 = vld [vmem:[%s4895_s4 + $0x8] sm:$0xff] (!%p3508_p5)   ;;  %3789 = vmatpush3.bf16.msra.mxu0 (!%p3508_p5), %v4048_v42  ;;  %v4050_v45 = vld [vmem:[%s4895_s4 + $0x10] sm:$0xff] (!%p3508_p5)  }
0x10e7   : > { %3790 = vmatprep.subr.bf16.mxu0 (!%p3508_p5), %v4049_v44 }
0x10e8   : > { %v3610_v48 = vpop.f32.mrb[40].mxu1  ;;  %2924 = vadd.xlane.f32.xlu0 %v2918_v47  ;;  %v2919_v49 = vadd.f32 %v2907_v46, %v4680_v55  ;;  %v4051_v46 = vld [vmem:[%s4895_s4 + $0x18] sm:$0xff] (!%p3508_p5)  }
0x10e9   : > { %v3611_v50 = vpop.f32.mrb[41].mxu1 }
0x10ea   : > { %v3612_v51 = vadd.f32 %v3611_v50, %v3610_v48  ;;  %v3613_v52 = vpop.f32.mrb[42].mxu1  ;;  %2926 = vadd.xlane.f32.xlu1 %v2919_v49  ;;  %3791 = vmatpush3.bf16.msra.mxu0 (!%p3508_p5), %v4049_v44  ;;  %v4053_v48 = vld [vmem:[%s4895_s4 + $0x28] sm:$0xff] (!%p3508_p5)   ;;  %v4055_v50 = vld [vmem:[%s4895_s4 + $0x38] sm:$0xff] (!%p3508_p5)  }
0x10eb   : > { %v3614_v10 = vpop.f32.mrb[43].mxu1  ;;  %3792 = vmatprep.subr.bf16.mxu0 (!%p3508_p5), %v4050_v45 }
0x10ec   : > { %v2912_v56 = vadd.f32 %v3612_v51, %v3489_v39  ;;  %v3615_v57 = vadd.f32 %v3614_v10, %v3613_v52  ;;  %v4119_v52 = vmov (!%p3508_p5), 0   ;;  %v4750_v10 = vand.u32 (!%p3508_p5), 127, %v1091_v11 }
0x10ed   : > { %4047 = vset.pattern.permute.xlu1 (!%p3508_p5), %v4119_v52  ;;  %4046 = vset.pattern.permute.xlu0 (!%p3508_p5), %v4119_v52 }
0x10ee   : > { %v2915_v58 = vadd.f32 %v3615_v57, %v3489_v39  ;;  %v2920_v60 = vadd.f32 %v2912_v56, %v4689_v1  ;;  %3793 = vmatpush3.bf16.msra.mxu0 (!%p3508_p5), %v4050_v45  ;;  %vm3124_vm7 = vcmp.eq.s32.totalorder (!%p3508_p5), %v4750_v10, 31  ;;  %v3509_v56 = vld [vmem:[%s4896_s5] ss:$0 sm:$0xff] (!%p3508_p5) }
0x10ef   : > { %3794 = vmatprep.subr.bf16.mxu0 (!%p3508_p5), %v4051_v46 }
0x10f0   : > { %2928 = vadd.xlane.f32.xlu0 %v2920_v60  ;;  %v2921_v62 = vadd.f32 %v2915_v58, %v4687_v27  ;;  %v4120_v58 = vmov (!%p3508_p5), 0.0  }
0x10f2   : > { %2930 = vadd.xlane.f32.xlu1 %v2921_v62  ;;  %3795 = vmatpush3.bf16.msra.mxu0 (!%p3508_p5), %v4051_v46 }
0x1175   : > { %v2925_v63 = vpop.xlane.xlu0 %2924 }
0x1176   : > { %v2932_v54 = vmul.f32 0.0078125, %v2925_v63 }
0x1177   : > { %v2927_v0 = vpop.xlane.xlu1 %2926 }
0x1178   : > { %v2936_v2 = vsub.f32 %v2918_v47, %v2932_v54  ;;  %v2933_v3 = vmul.f32 0.0078125, %v2927_v0  ;;  %v4052_v47 = vld [vmem:[%s4895_s4 + $0x20] sm:$0xff] (!%p3508_p5)  }
0x1179   : > { %3796 = vmatprep.subr.bf16.mxu0 (!%p3508_p5), %v4052_v47 }
0x117a   : > { %v2937_v55 = vsub.f32 %v2919_v49, %v2933_v3  ;;  %v2940_v6 = vmul.f32 %v2936_v2, %v2936_v2  ;;  %3797 = vmatpush3.bf16.msra.mxu0 (!%p3508_p5), %v4052_v47  ;;  %v4054_v49 = vld [vmem:[%s4895_s4 + $0x30] sm:$0xff] (!%p3508_p5)  }
0x117b   : > { %3798 = vmatprep.subr.bf16.mxu0 (!%p3508_p5), %v4053_v48 }
0x117c   : > { %2944 = vadd.xlane.f32.xlu0 %v2940_v6  ;;  %v2941_v4 = vmul.f32 %v2937_v55, %v2937_v55 }
0x117d   : > { %v2929_v8 = vpop.xlane.xlu0 %2928 }
0x117e   : > { %v2934_v16 = vmul.f32 0.0078125, %v2929_v8  ;;  %2946 = vadd.xlane.f32.xlu1 %v2941_v4  ;;  %3799 = vmatpush3.bf16.msra.mxu0 (!%p3508_p5), %v4053_v48 }
0x117f   : > { %v2931_v53 = vpop.xlane.xlu1 %2930  ;;  %3800 = vmatprep.subr.bf16.mxu0 (!%p3508_p5), %v4054_v49 }
0x1180   : > { %v2938_v26 = vsub.f32 %v2920_v60, %v2934_v16  ;;  %v2935_v19 = vmul.f32 0.0078125, %v2931_v53  ;;  %v3125_v60 = vsel (!%p3508_p5), %vm3124_vm7, -1e+09, %v4120_v58  ;;  %v4121_v58 = vmov (!%p3508_p5), -1e+09  }
0x1182   : > { %v2939_v1 = vsub.f32 %v2921_v62, %v2935_v19  ;;  %v2942_v37 = vmul.f32 %v2938_v26, %v2938_v26  ;;  %3801 = vmatpush3.bf16.msra.mxu0 (!%p3508_p5), %v4054_v49 }
0x1183   : > { %3802 = vmatprep.subr.bf16.mxu0 (!%p3508_p5), %v4055_v50 }
0x1184   : > { %2948 = vadd.xlane.f32.xlu0 %v2942_v37  ;;  %v2943_v27 = vmul.f32 %v2939_v1, %v2939_v1  ;;  %v3122_v37 = vld [vmem:[%s4897_s28 + $0x10] sm:$0xff] (!%p3508_p5) }
0x1185   : > { %vm3184_vm10 = vcmp.ne.s32.totalorder (!%p3508_p5), %v3122_v37, 31 }
0x1186   : > { %2950 = vadd.xlane.f32.xlu1 %v2943_v27  ;;  %3803 = vmatpush3.bf16.msra.mxu0 (!%p3508_p5), %v4055_v50  ;;  %v3120_v27 = vld [vmem:[%s4897_s28] sm:$0xff] (!%p3508_p5) }
0x1187   : > { %vm3182_vm8 = vcmp.ne.s32.totalorder (!%p3508_p5), %v3120_v27, 31 }
0x1209   : > { %v2945_v38 = vpop.xlane.xlu0 %2944 }
0x120a   : > { %v2952_v61 = vmul.f32 0.0078125, %v2945_v38  ;;  %v3123_v38 = vld [vmem:[%s4897_s28 + $0x18] sm:$0xff] (!%p3508_p5) }
0x120b   : > { %v2947_v20 = vpop.xlane.xlu1 %2946  ;;  %vm3185_vm11 = vcmp.ne.s32.totalorder (!%p3508_p5), %v3123_v38, 31 }
0x120c   : > { %v2956_v59 = vadd.f32 1e-05, %v2952_v61  ;;  %v2953_v21 = vmul.f32 0.0078125, %v2947_v20  ;;  %v3206_v61 = vsel (!%p3508_p5), %vm3182_vm8, 1, %v4119_v52 }
0x120e   : > { %4034 = vrsqrt.f32 %v2956_v59  ;;  %v2957_v22 = vadd.f32 1e-05, %v2953_v21  ;;  %v3208_v59 = vsel (!%p3508_p5), %vm3184_vm10, 1, %v4119_v52 }
0x1210   : > { %4036 = vrsqrt.f32 %v2957_v22 }
0x1211   : > { %v2949_v23 = vpop.xlane.xlu0 %2948 }
0x1212   : > { %v2954_v24 = vmul.f32 0.0078125, %v2949_v23 }
0x1213   : > { %v2951_v25 = vpop.xlane.xlu1 %2950 }
0x1214   : > { %v2958_v30 = vadd.f32 1e-05, %v2954_v24  ;;  %v2955_v14 = vmul.f32 0.0078125, %v2951_v25 }
0x1216   : > { %4038 = vrsqrt.f32 %v2958_v30  ;;  %v2959_v28 = vadd.f32 1e-05, %v2955_v14 }
0x1218   : > { %v4035_v33 = vpop.eup %4034  ;;  %4040 = vrsqrt.f32 %v2959_v28 }
0x1219   : > { %v2964_v13 = vmul.f32 %v4035_v33, %v2936_v2 }
0x121a   : > { %v4037_v9 = vpop.eup %4036 }
0x121b   : > { %v2974_v15 = vmul.f32 %v3506_v34, %v2964_v13  ;;  %v2965_v17 = vmul.f32 %v4037_v9, %v2937_v55 }
0x121d   : > { %v2984_v18 = vadd.f32 %v3507_v12, %v2974_v15  ;;  %v2975_v7 = vmul.f32 %v3506_v34, %v2965_v17 }
0x121f   : > { %2988 = vst [vmem:[#allocation2] sm:$0xff] %v2984_v18  ;;  %v2985_v29 = vadd.f32 %v3507_v12, %v2975_v7 }
0x1220   : > { %v4039_v31 = vpop.eup %4038 }
0x1221   : > { %2989 = vst [vmem:[#allocation2 + $0x8] sm:$0xff] %v2985_v29  ;;  %v2966_v5 = vmul.f32 %v4039_v31, %v2938_v26  ;;  %v2996_v43 = vpack.c.bf16 (!%p3508_p5), %v2985_v29, %v2984_v18 }
0x1222   : > { %v4041_v32 = vpop.eup %4040 }
0x1223   : > { %v2976_v35 = vmul.f32 %v3506_v34, %v2966_v5  ;;  %v2967_v36 = vmul.f32 %v4041_v32, %v2939_v1  ;;  %2995 = sbr.rel (%p3508_p5) target bundleno = 5195 (0x144b), region = 112  ;;  %3804 = vmatprep.mubr.bf16.mxu0 (!%p3508_p5), %v2996_v43  ;;  %v3121_v1 = vld [vmem:[%s4897_s28 + $0x8] sm:$0xff] (!%p3508_p5)  ;;  %v3209_v32 = vsel (!%p3508_p5), %vm3185_vm11, 1, %v4119_v52 }
0x1224   : > { %vm3183_vm9 = vcmp.ne.s32.totalorder (!%p3508_p5), %v3121_v1, 31 }
0x1225   : > { %v2986_v39 = vadd.f32 %v3507_v12, %v2976_v35  ;;  %v2977_v40 = vmul.f32 %v3506_v34, %v2967_v36  ;;  %v3207_v20 = vsel (!%p3508_p5), %vm3183_vm9, 1, %v4119_v52 }
0x1227   : > { %2990 = vst [vmem:[#allocation2 + $0x10] sm:$0xff] %v2986_v39  ;;  %v2987_v41 = vadd.f32 %v3507_v12, %v2977_v40 }
0x1229   : > { %2991 = vst [vmem:[#allocation2 + $0x18] sm:$0xff] %v2987_v41  ;;  %v2997_v51 = vpack.c.bf16 (!%p3508_p5), %v2987_v41, %v2986_v39 }
0x122b   : > { %3805 = vmatmul.mubr.bf16.vlgmr.msra.gmra.mrb[0].mxu0 %v2997_v51 }
0x12fe   : > { %v3806_v57 = vpop.f32.mrb[0].mxu0 }
0x12ff   : > { %v3112_v62 = vadd.f32 %v3806_v57, %v3509_v56  ;;  %v3103_v63 = vpop.f32.mrb[1].mxu0 }
0x1300   : > { %v3104_v54 = vadd.f32 %v3509_v56, %v3103_v63  ;;  %v3807_v0 = vpop.f32.mrb[2].mxu0 }
0x1301   : > { %v4756_v2 = vadd.f32 %v3125_v60, %v3112_v62  ;;  %v3115_v3 = vadd.f32 %v3807_v0, %v3509_v56  ;;  %v3106_v55 = vpop.f32.mrb[3].mxu0 }
0x1302   : > { %v4758_v6 = vadd.f32 %v3125_v60, %v3104_v54  ;;  %v3107_v11 = vadd.f32 %v3509_v56, %v3106_v55 }
0x1303   : > { %v4760_v4 = vadd.f32 %v3125_v60, %v3115_v3  ;;  %v3136_v8 = vsel %vm1342_vm3, %v4756_v2, -inf }
0x1304   : > { %v4764_v16 = vadd.f32 %v3125_v60, %v3107_v11  ;;  %3137 = vmax.xlane.f32.xlu1 %v3136_v8  ;;  %v3130_v53 = vsel %vm1342_vm3, %v4758_v6, -inf }
0x1305   : > { %3131 = vmax.xlane.f32.xlu0 %v3130_v53  ;;  %v3139_v26 = vsel %vm1342_vm3, %v4760_v4, -inf }
0x1306   : > { %v3133_v19 = vsel %vm1342_vm3, %v4764_v16, -inf }
0x1308   : > { %3140 = vmax.xlane.f32.xlu1 %v3139_v26 }
0x1309   : > { %3134 = vmax.xlane.f32.xlu0 %v3133_v19 }
0x1319   : > { %3190 = vperm.xlu1 %4047, %v3121_v1  }
0x131d   : > { %3193 = vperm.xlu1 %4047, %v3122_v37  }
0x1321   : > { %3196 = vperm.xlu1 %4047, %v3123_v38  }
0x1325   : > { %3211 = vperm.xlu1 %4047, %v3206_v61  }
0x1329   : > { %3214 = vperm.xlu1 %4047, %v3207_v20  }
0x132d   : > { %3217 = vperm.xlu1 %4047, %v3208_v59  }
0x1391   : > { %v3138_v21 = vpop.xlane.xlu1 %3137 }
0x1392   : > { %v3144_v22 = vsub.f32 %v4756_v2, %v3138_v21  ;;  %v4788_v23 = vpop.xlane.xlu0 %3131 }
0x1393   : > { %v3142_v24 = vsub.f32 %v4758_v6, %v4788_v23 }
0x1394   : > { %v3150_v25 = vmul.f32 1.442695, %v3144_v22 }
0x1395   : > { %v3146_v30 = vmul.f32 1.442695, %v3142_v24  ;;  %v3141_v14 = vpop.xlane.xlu1 %3140 }
0x1396   : > { %4056 = vpow2.f32 %v3150_v25  ;;  %v3145_v28 = vsub.f32 %v4760_v4, %v3141_v14  ;;  %v4793_v33 = vpop.xlane.xlu0 %3134 }
0x1397   : > { %v3143_v34 = vsub.f32 %v4764_v16, %v4793_v33  ;;  %4058 = vpow2.f32 %v3146_v30 }
0x1398   : > { %v3152_v13 = vmul.f32 1.442695, %v3145_v28 }
0x1399   : > { %v3148_v9 = vmul.f32 1.442695, %v3143_v34  ;;  %v3191_v35 = vpop.permute.xlu1 %3190 }
0x139a   : > { %4060 = vpow2.f32 %v3152_v13  ;;  %vm3199_vm1 = vcmp.eq.s32.totalorder %v4750_v10, %v3191_v35 }
0x139b   : > { %4062 = vpow2.f32 %v3148_v9  ;;  %v3203_v38 = vsel %vm3199_vm1, 0.0, %v4121_v58 }
0x139d   : > { %v3194_v36 = vpop.permute.xlu1 %3193 }
0x139e   : > { %vm3200_vm12 = vcmp.eq.s32.totalorder %v4750_v10, %v3194_v36 }
0x139f   : > { %v3204_v60 = vsel %vm3200_vm12, 0.0, %v4121_v58 }
0x13a0   : > { %v4057_v12 = vpop.eup %4056 }
0x13a1   : > { %v3160_v15 = vsel %vm1342_vm3, %v4057_v12, 0.0  ;;  %v4059_v17 = vpop.eup %4058  ;;  %v3197_v39 = vpop.permute.xlu1 %3196 }
0x13a2   : > { %3161 = vadd.xlane.f32.xlu0 %v3160_v15  ;;  %v3154_v29 = vsel %vm1342_vm3, %v4059_v17, 0.0  ;;  %vm3201_vm15 = vcmp.eq.s32.totalorder %v4750_v10, %v3197_v39 }
0x13a3   : > { %v3205_v53 = vsel %vm3201_vm15, 0.0, %v4121_v58 }
0x13a4   : > { %v4061_v18 = vpop.eup %4060 }
0x13a5   : > { %v3163_v7 = vsel %vm1342_vm3, %v4061_v18, 0.0  ;;  %v4063_v31 = vpop.eup %4062  ;;  %v3212_v40 = vpop.permute.xlu1 %3211 }
0x13a6   : > { %3164 = vadd.xlane.f32.xlu1 %v3163_v7  ;;  %3155 = vadd.xlane.f32.xlu0 %v3154_v29  ;;  %v3157_v5 = vsel %vm1342_vm3, %v4063_v31, 0.0  ;;  %vm3222_vm2 = vcmp.eq.s32.totalorder %v3212_v40, 1 }
0x13a9   : > { %v3215_v41 = vpop.permute.xlu1 %3214 }
0x13aa   : > { %3158 = vadd.xlane.f32.xlu1 %v3157_v5  ;;  %vm3223_vm4 = vcmp.eq.s32.totalorder %v3215_v41, 1 }
0x13ad   : > { %v3218_v42 = vpop.permute.xlu1 %3217 }
0x13ae   : > { %vm3224_vm13 = vcmp.eq.s32.totalorder %v3218_v42, 1 }
0x13bb   : > { %3220 = vperm.xlu1 %4047, %v3209_v32  }
0x13bc   : > { %3187 = vperm.xlu0 %4046, %v3120_v27  }
0x142f   : > { %v3162_v43 = vpop.xlane.xlu0 %3161 }
0x1430   : > { %4064 = vlog2.f32 %v3162_v43 }
0x1433   : > { %v3165_v44 = vpop.xlane.xlu1 %3164  ;;  %v3156_v45 = vpop.xlane.xlu0 %3155 }
0x1434   : > { %4066 = vlog2.f32 %v3165_v44 }
0x1435   : > { %4068 = vlog2.f32 %v3156_v45 }
0x1437   : > { %v3159_v46 = vpop.xlane.xlu1 %3158 }
0x1438   : > { %4070 = vlog2.f32 %v3159_v46 }
0x143a   : > { %v4065_v47 = vpop.eup %4064 }
0x143b   : > { %v3171_v48 = vmul.f32 0.6931472, %v4065_v47  ;;  %v3188_v50 = vpop.permute.xlu0 %3187  ;;  %v3221_v0 = vpop.permute.xlu1 %3220 }
0x143c   : > { %vm3198_vm14 = vcmp.eq.s32.totalorder %v4750_v10, %v3188_v50  ;;  %vm3225_vm0 = vcmp.eq.s32.totalorder %v3221_v0, 1 }
0x143d   : > { %v3176_v49 = vadd.f32 %v3171_v48, %v3138_v21  ;;  %v3202_v8 = vsel %vm3198_vm14, 0.0, %v4121_v58 }
0x143e   : > { %v4067_v51 = vpop.eup %4066 }
0x143f   : > { %v4069_v52 = vpop.eup %4068  ;;  %v3180_v56 = vsub.f32 %v4756_v2, %v3176_v49  ;;  %v3173_v57 = vmul.f32 0.6931472, %v4067_v51 }
0x1440   : > { %v3167_v62 = vmul.f32 0.6931472, %v4069_v52 }
0x1441   : > { %v3228_v63 = vsel %vm3224_vm13, %v3204_v60, %v3180_v56  ;;  %v3177_v54 = vadd.f32 %v3173_v57, %v3141_v14 }
0x1442   : > { %v4071_v3 = vpop.eup %4070  ;;  %3232 = vst.msk [vmem:[#allocation3 + $0x10] sm:$0xff] %vm1342_vm3, %v3228_v63  ;;  %v3174_v55 = vadd.f32 %v3167_v62, %v4788_v23 }
0x1443   : > { %v3169_v11 = vmul.f32 0.6931472, %v4071_v3  ;;  %v3181_v2 = vsub.f32 %v4760_v4, %v3177_v54 }
0x1444   : > { %v3178_v26 = vsub.f32 %v4758_v6, %v3174_v55 }
0x1445   : > { %v3175_v19 = vadd.f32 %v3169_v11, %v4793_v33  ;;  %v3229_v1 = vsel %vm3225_vm0, %v3205_v53, %v3181_v2 }
0x1446   : > { %3233 = vst.msk [vmem:[#allocation3 + $0x18] sm:$0xff] %vm1342_vm3, %v3229_v1  ;;  %v3226_v37 = vsel %vm3222_vm2, %v3202_v8, %v3178_v26 }
0x1447   : > { %v3179_v27 = vsub.f32 %v4764_v16, %v3175_v19  ;;  %3230 = vst.msk [vmem:[#allocation3] sm:$0xff] %vm1342_vm3, %v3226_v37 }
0x1449   : > { %v3227_v4 = vsel %vm3223_vm4, %v3203_v38, %v3179_v27 }
0x144a   : > { %3231 = vst.msk [vmem:[#allocation3 + $0x8] sm:$0xff] %vm1342_vm3, %v3227_v4 }
0x144b PF: > { %p3814_p6 = scmp.eq.s32.totalorder %s4241_s25, 3  ;;  %s4122_s30 = smov [#allocation3]  }
0x144c   : > { %s3240_s23 = sshll.u32 %s4122_s30, 4  ;;  %s3241_s23 = int_to_ptr.vmem [resolvable:$true] %s3240_s23 }
0x144d   : > { %s4072_s11 = scalar_lea.vmem %s3241_s23, 512  ;;  %p4079_p10 = scmp.lt.s32.totalorder %s3241_s23, %s3241_s23 }
0x144e   : > { %p4073_p7 = scmp.ne.s32.totalorder %s3241_s23, %s4072_s11  ;;  %p4080_p11 = scmp.lt.s32.totalorder %s4072_s11, %s4072_s11 }
0x1450   : > { %p4074_p8 = pnand %p4073_p7, %p3814_p6  ;;  %p4081_p12 = por %p4080_p11, %p4079_p10 }
0x1452   : > { %p4075_p9 = pneg %p4074_p8 }
0x1454   : > { %p4082_p13 = pnand %p4081_p12, %p4075_p9 }
0x1456   : > { %4085 = shalt.err (!%p4082_p13)
}
0x1457   : > { %s4898_s24 = sld [smem:[#allocation18_spill]] }
0x145d   : > { %s4086_s26 = scalar_lea.hbm %s4898_s24, 512 }
0x145e   : > { %p4087_p0 = scmp.ne.s32.totalorder %s4898_s24, %s4086_s26  ;;  %p4092_p3 = scmp.lt.u32.totalorder %s4086_s26, %s4898_s24 }
0x1460   : > { %p4088_p1 = pnand %p4087_p0, %p3814_p6 }
0x1462   : > { %p4089_p2 = pneg %p4088_p1 }
0x1464   : > { %p4094_p4 = pnand %p4092_p3, %p4089_p2 }
0x1466   : > { %4097 = shalt.err (!%p4094_p4)
}
0x1467   : > { %s4123_s2 = smov 128   ;;  %s4124_s29 = smov 8  }
0x1468   : > { %3811 = dma.vmem_to_hbm [thread:$0]  (%p3814_p6), %s3241_s23, 512, %s4898_s24, [#allocation4], %s4123_s2, %s4123_s2, %s4124_s29  }
0x1469   : > { %4103 = dma.done.wait (%p3814_p6), [#allocation4], 512  }
0x146a   : > { %4105 = vsyncadd (%p3814_p6), [#allocation4], 4294966784 }
0x146b PF: > { %s4899_s3 = sld [smem:[#allocation6_spill]] }
0x1471   : > { %s32_s2 = sadd.s32 1, %s4899_s3  }
0x1472   : > { %p29_p5 = scmp.ge.s32.totalorder %s32_s2, 6  }
0x1474   :  { %31 = sbr.rel (!%p29_p5) target bundleno = 14 (0xe), region = 172 }
0x147b   :  { %3256 = vsyncpa [#allocation4], 1 }
0x147c   :  { %3258 = vsyncpa [#allocation4 + $0x1], 1 }

</bundles_post_ra>
